<compile_context>
chip_gen: v7x
topology: tpu7x:2x2x1
jax: 0.10.0
libtpu: 0.0.40
codegen_flags: <defaults>
</compile_context>

<pallas_src>
import functools

import jax
import jax.numpy as jnp
from jax.experimental import pallas as pl
from jax.experimental.pallas import tpu as pltpu

NEG_SLOPE = 0.2
IN_EPS = 1e-5

# Per-grid-step operand budget used for pixel-tile sizing (double-buffering already
# counted in the bytes/pixel estimates below) and the explicit scoped-VMEM limit.
_TILE_BUDGET_BYTES = 10 * 1024 * 1024
_VMEM_LIMIT_BYTES = 48 * 1024 * 1024


def _pick_pixel_tile(p, bytes_per_pixel):
    """Largest lane tile within the VMEM budget that divides p exactly.

    Multiples of 128 when tiling; the full axis when it fits (no masking/padding).
    """
    cap = max(128, (_TILE_BUDGET_BYTES // max(1, bytes_per_pixel)) // 128 * 128)
    if p <= cap:
        return p
    for t in range(cap, 127, -128):
        if p % t == 0:
            return t
    return p  # ragged p: fall back to a single full block


# ---------- Kernel 1: deconv GEMM + bias + LeakyReLU + fused channel pooling -----

def _deconv_lrelu_pool_kernel(x_ref, w_ref, b_ref, y_ref, psum_ref, pmax_ref):
    j = pl.program_id(1)

    # (M, Cin) @ (Cin, tp) on the MXU, f32 accumulation.
    acc = jnp.dot(w_ref[...], x_ref[0], preferred_element_type=jnp.float32)
    y = acc + b_ref[...]
    y = jnp.where(y > 0.0, y, NEG_SLOPE * y)
    y_ref[...] = y[None].astype(y_ref.dtype)

    # Channel-attention pooling partials (computed on the f32 value, pre-bf16-cast),
    # accumulated in the resident (n, 0, 0) output block across pixel tiles.
    ps = jnp.sum(y, axis=-1, keepdims=True)            # (M, 1)
    pm = jnp.max(y, axis=-1, keepdims=True)            # (M, 1)

    @pl.when(j == 0)
    def _():
        psum_ref[...] = ps[None]
        pmax_ref[...] = pm[None]

    @pl.when(j > 0)
    def _():
        psum_ref[...] += ps[None]
        pmax_ref[...] = jnp.maximum(pmax_ref[...], pm[None])


def deconv_lrelu_pool(x_flat, w_g, b_col):
    """x_flat: (N, Cin, HW) bf16, w_g: (M, Cin) bf16, b_col: (M, 1) f32.

    Returns y: (N, M, HW) bf16, per-row sum and max pools: (N, M) f32 each,
    where M = Cout * s * s.
    """
    nb, cin, hw = x_flat.shape
    m = w_g.shape[0]
    bytes_per_pixel = 4 * (cin + m)  # bf16 x-in + bf16 y-out, double-buffered
    tp = _pick_pixel_tile(hw, bytes_per_pixel)

    y, psum, pmax = pl.pallas_call(
        _deconv_lrelu_pool_kernel,
        out_shape=(jax.ShapeDtypeStruct((nb, m, hw), jnp.bfloat16),
                   jax.ShapeDtypeStruct((nb, m, 1), jnp.float32),
                   jax.ShapeDtypeStruct((nb, m, 1), jnp.float32)),
        grid_spec=pltpu.PrefetchScalarGridSpec(
            num_scalar_prefetch=0,
            grid=(nb, hw // tp),
            in_specs=[
                pl.BlockSpec((1, cin, tp), lambda n, j: (n, 0, j)),
                pl.BlockSpec((m, cin), lambda n, j: (0, 0)),
                pl.BlockSpec((m, 1), lambda n, j: (0, 0)),
            ],
            out_specs=[
                pl.BlockSpec((1, m, tp), lambda n, j: (n, 0, j)),
                pl.BlockSpec((1, m, 1), lambda n, j: (n, 0, 0)),
                pl.BlockSpec((1, m, 1), lambda n, j: (n, 0, 0)),
            ],
        ),
        compiler_params=pltpu.CompilerParams(
            # Pixel axis must be "arbitrary": the pool accumulators live in the
            # resident output block.  Batch stays "parallel" for megacore (v7x).
            dimension_semantics=("parallel", "arbitrary"),
            vmem_limit_bytes=_VMEM_LIMIT_BYTES),
    )(x_flat, w_g, b_col)
    return y, psum[..., 0], pmax[..., 0]


# ---------- Kernel 2: gated 1x1 conv + fully fused instance norm (two-phase) ------

def _gated_conv_inorm_kernel(y_ref, w_ref, o_ref, sum_s, ssq_s, mean_s, rstd_s,
                             *, inv_p):
    ph = pl.program_id(1)
    j = pl.program_id(2)

    # z is recomputed in phase 1 instead of being round-tripped through HBM; the
    # (C, C) @ (C, tp) flops are negligible versus the saved f32 write + read.
    z = jnp.dot(w_ref[0], y_ref[0], preferred_element_type=jnp.float32)  # (C, tp)

    @pl.when(jnp.logical_and(ph == 0, j == 0))
    def _():
        sum_s[...] = jnp.zeros_like(sum_s)
        ssq_s[...] = jnp.zeros_like(ssq_s)

    @pl.when(ph == 0)
    def _():
        sum_s[...] += jnp.sum(z, axis=-1, keepdims=True)
        ssq_s[...] += jnp.sum(z * z, axis=-1, keepdims=True)

    @pl.when(jnp.logical_and(ph == 1, j == 0))
    def _():
        # One-pass E[x^2]-E[x]^2 in f32 (clamped).  TODO(synk): switch to a shifted
        # two-pass formulation if P grows beyond ~1e5 and cancellation matters.
        mu = sum_s[...] * inv_p
        var = jnp.maximum(ssq_s[...] * inv_p - mu * mu, 0.0)
        mean_s[...] = mu
        rstd_s[...] = jax.lax.rsqrt(var + IN_EPS)

    @pl.when(ph == 1)
    def _():
        o_ref[...] = ((z - mean_s[...]) * rstd_s[...])[None].astype(o_ref.dtype)


def gated_conv1x1_instance_norm(y, w_fold):
    """y: (N, C, P) bf16, w_fold: (N, C, C) bf16 (gate already folded in).

    Returns the instance-normalized 1x1-conv output, (N, C, P) f32, same (permuted)
    pixel order as y.  The conv bias cancels exactly under the non-affine norm.
    """
    nb, c, p = y.shape
    bytes_per_pixel = 4 * c + 8 * c  # bf16 y-in + f32 out, double-buffered
    tp = _pick_pixel_tile(p, bytes_per_pixel)

    kernel = functools.partial(_gated_conv_inorm_kernel, inv_p=1.0 / p)
    return pl.pallas_call(
        kernel,
        out_shape=jax.ShapeDtypeStruct((nb, c, p), jnp.float32),
        grid_spec=pltpu.PrefetchScalarGridSpec(
            num_scalar_prefetch=0,
            grid=(nb, 2, p // tp),
            in_specs=[
                pl.BlockSpec((1, c, tp), lambda n, ph, j: (n, 0, j)),
                pl.BlockSpec((1, c, c), lambda n, ph, j: (n, 0, 0)),
            ],
            # Phase 0 (stats only) keeps the output buffer parked on block (n,0,0),
            # so no never-written block is ever flushed; every revisit of (n,0,0)
            # is consecutive and phase 1 writes each block exactly once.
            out_specs=pl.BlockSpec((1, c, tp), lambda n, ph, j: (n, 0, j * ph)),
            scratch_shapes=[
                pltpu.VMEM((c, 1), jnp.float32),   # sum
                pltpu.VMEM((c, 1), jnp.float32),   # sum of squares
                pltpu.VMEM((c, 1), jnp.float32),   # mean
                pltpu.VMEM((c, 1), jnp.float32),   # rstd
            ],
        ),
        compiler_params=pltpu.CompilerParams(
            dimension_semantics=("parallel", "arbitrary", "arbitrary"),
            vmem_limit_bytes=_VMEM_LIMIT_BYTES),
    )(y, w_fold)


# ------------------------------------ forward -------------------------------------

def reconstruction_forward(x, params):
    """x: (N, Cin, H, W) f32 NCHW -> (N, Cout, H*up, W*up) f32."""
    wd, bd = params["deconv_w"], params["deconv_b"]      # (Cin, Cout, s, s), (Cout,)
    w_fc1, w_fc2 = params["fc1_w"], params["fc2_w"]      # (C//r, C), (C, C//r)
    w1 = params["conv1x1_w"]                             # (Cout, Cout, 1, 1)
    # Note: the conv1x1 bias cancels exactly under the non-affine InstanceNorm2d
    # ((z + b) - mean(z + b) == z - mean(z)), so it is intentionally never applied.

    nb, cin, h, w = x.shape
    _, cout, s, _ = wd.shape
    ho, wo = h * s, w * s
    hw = h * w
    p = ho * wo
    m = cout * s * s

    # ConvTranspose2d with kernel == stride has no overlap -> per-batch GEMM in the
    # native NCHW layout.  The output pixel order is the permuted (kh, kw, h, w)
    # order; pooling / 1x1 conv / instance norm are all invariant to it.
    x_flat = x.reshape(nb, cin, hw).astype(jnp.bfloat16)
    w_g = wd.transpose(1, 2, 3, 0).reshape(m, cin).astype(jnp.bfloat16)
    b_col = jnp.repeat(bd, s * s).astype(jnp.float32).reshape(m, 1)

    y, ysum, ymax = deconv_lrelu_pool(x_flat, w_g, b_col)   # y: (N, M, HW) bf16

    # ChannelAttention gate.  Reduce the per-(co,kh,kw) pools to per-channel pools,
    # then the tiny (C -> C/16 -> C) MLP + sigmoid stays in plain JAX.
    # TODO(synk): the attention MLP is sub-vreg sized, so it is not a Pallas kernel.
    mean_c = ysum.reshape(nb, cout, s * s).sum(-1) / p       # (N, C)
    max_c = ymax.reshape(nb, cout, s * s).max(-1)            # (N, C)

    def fc(v):
        return jnp.maximum(v @ w_fc1.T, 0.0) @ w_fc2.T

    gate = jax.nn.sigmoid(fc(mean_c) + fc(max_c))            # (N, C)

    # Fold the per-(n, ci) gate into the 1x1-conv weight:  W @ (g*y) == (W*g) @ y.
    w_fold = (w1.reshape(cout, cout)[None, :, :] * gate[:, None, :]).astype(jnp.bfloat16)

    # (N, Cout*s*s, HW) -> (N, Cout, s*s*HW) is a contiguous (free) reshape.
    y_cp = y.reshape(nb, cout, p)

    out_perm = gated_conv1x1_instance_norm(y_cp, w_fold)     # (N, C, P) f32

    # Single final permutation of the f32 output back to true NCHW pixel order.
    out = (out_perm.reshape(nb, cout, s, s, h, w)
           .transpose(0, 1, 4, 2, 5, 3)
           .reshape(nb, cout, ho, wo))
    return out


# --------------------------- pure-jnp reference (self-check) ----------------------

def reference_forward(x, params):
    wd, bd = params["deconv_w"], params["deconv_b"]
    w_fc1, w_fc2 = params["fc1_w"], params["fc2_w"]
    w1, b1 = params["conv1x1_w"], params["conv1x1_b"]
    nb, cin, h, w = x.shape
    _, cout, s, _ = wd.shape
    ho, wo = h * s, w * s
    p = ho * wo

    t = jnp.einsum("nihw,iokl->nohkwl", x.astype(jnp.bfloat16),
                   wd.astype(jnp.bfloat16), preferred_element_type=jnp.float32)
    t = t.reshape(nb, cout, ho, wo) + bd[None, :, None, None]
    t = jnp.where(t > 0.0, t, NEG_SLOPE * t)                 # f32 y

    tf = t.reshape(nb, cout, p)
    mean_c = jnp.mean(tf, axis=-1)
    max_c = jnp.max(tf, axis=-1)

    def fc(v):
        return jnp.maximum(v @ w_fc1.T, 0.0) @ w_fc2.T

    gate = jax.nn.sigmoid(fc(mean_c) + fc(max_c))
    w_s = (w1.reshape(cout, cout)[None] * gate[:, None, :]).astype(jnp.bfloat16)
    yb = tf.astype(jnp.bfloat16)                             # kernel stores y as bf16
    z = jnp.einsum("noc,ncp->nop", w_s, yb,
                   preferred_element_type=jnp.float32) + b1[None, :, None]
    mu = jnp.mean(z, axis=-1, keepdims=True)
    var = jnp.mean((z - mu) ** 2, axis=-1, keepdims=True)
    out = (z - mu) * jax.lax.rsqrt(var + IN_EPS)
    return out.reshape(nb, cout, ho, wo)


def init_params(key, cin, cout, up, reduction=16):
    ks = jax.random.split(key, 6)
    return {
        "deconv_w": 0.1 * jax.random.normal(ks[0], (cin, cout, up, up), jnp.float32),
        "deconv_b": 0.05 * jax.random.normal(ks[1], (cout,), jnp.float32),
        "fc1_w": 0.3 * jax.random.normal(ks[2], (cout // reduction, cout), jnp.float32),
        "fc2_w": 0.3 * jax.random.normal(ks[3], (cout, cout // reduction), jnp.float32),
        "conv1x1_w": 0.1 * jax.random.normal(ks[4], (cout, cout, 1, 1), jnp.float32),
        "conv1x1_b": 0.05 * jax.random.normal(ks[5], (cout,), jnp.float32),
    }


if __name__ == "__main__":
    key = jax.random.PRNGKey(0)
    kx, kp = jax.random.split(key)
    NB, CIN, COUT, UP, H = 2, 64, 32, 2, 16
    x = jax.random.normal(kx, (NB, CIN, H, H), jnp.float32)
    params = init_params(kp, CIN, COUT, UP)

    out = jax.block_until_ready(jax.jit(reconstruction_forward)(x, params))
    assert out.shape == (NB, COUT, H * UP, H * UP), out.shape
    assert bool(jnp.all(jnp.isfinite(out)))

    ref = jax.block_until_ready(jax.jit(reference_forward)(x, params))
    err = float(jnp.max(jnp.abs(out - ref)))
    assert err < 5e-2, f"max abs err {err}"
    print("KERNEL_OK")
</pallas_src>

<mosaic_0001>
module attributes {stable_mosaic.version = 11 : i64} {
  func.func @_deconv_lrelu_pool_kernel(%arg0: i32, %arg1: i32, %arg2: memref<1x64x256xbf16, #tpu.memory_space<vmem>>, %arg3: memref<128x64xbf16, #tpu.memory_space<vmem>>, %arg4: memref<128x1xf32, #tpu.memory_space<vmem>>, %arg5: memref<1x128x256xbf16, #tpu.memory_space<vmem>>, %arg6: memref<1x128x1xf32, #tpu.memory_space<vmem>>, %arg7: memref<1x128x1xf32, #tpu.memory_space<vmem>>) attributes {dimension_semantics = [#tpu.dimension_semantics<parallel>, #tpu.dimension_semantics<arbitrary>], iteration_bounds = array<i64: 2, 1>, scalar_prefetch = 0 : i64, scratch_operands = 0 : i64, tpu.core_type = #tpu.core_type<tc>, window_params = [{transform_indices = @transform_0, window_bounds = array<i64: 1, 64, 256>}, {pipeline_mode = #tpu.pipeline_mode<synchronous>, transform_indices = @transform_1, window_bounds = array<i64: 128, 64>}, {pipeline_mode = #tpu.pipeline_mode<synchronous>, transform_indices = @transform_2, window_bounds = array<i64: 128, 1>}, {transform_indices = @transform_3, window_bounds = array<i64: 1, 128, 256>}, {transform_indices = @transform_4, window_bounds = array<i64: 1, 128, 1>}, {transform_indices = @transform_5, window_bounds = array<i64: 1, 128, 1>}]} {
    %c0 = arith.constant 0 : index
    %c0_0 = arith.constant 0 : index
    %0 = vector.load %arg3[%c0, %c0_0] : memref<128x64xbf16, #tpu.memory_space<vmem>>, vector<128x64xbf16>
    %c0_1 = arith.constant 0 : index
    %c0_2 = arith.constant 0 : index
    %c0_3 = arith.constant 0 : index
    %1 = vector.load %arg2[%c0_1, %c0_2, %c0_3] : memref<1x64x256xbf16, #tpu.memory_space<vmem>>, vector<1x64x256xbf16>
    %2 = vector.shape_cast %1 : vector<1x64x256xbf16> to vector<64x256xbf16>
    %cst = arith.constant dense<0.000000e+00> : vector<128x256xf32>
    %3 = tpu.matmul %0, %2, %cst {dimension_numbers = #tpu.dot_dimension_numbers<[1], [0], [0], [1], [0, 0, 1, 1], [], []>} : vector<128x64xbf16>, vector<64x256xbf16>, vector<128x256xf32> -> vector<128x256xf32>
    %c0_4 = arith.constant 0 : index
    %c0_5 = arith.constant 0 : index
    %4 = vector.load %arg4[%c0_4, %c0_5] : memref<128x1xf32, #tpu.memory_space<vmem>>, vector<128x1xf32>
    %5 = vector.broadcast %4 : vector<128x1xf32> to vector<128x256xf32>
    %6 = arith.addf %3, %5 : vector<128x256xf32>
    %cst_6 = arith.constant 0.000000e+00 : f32
    %7 = vector.broadcast %cst_6 : f32 to vector<128x256xf32>
    %8 = arith.cmpf ogt, %6, %7 : vector<128x256xf32>
    %cst_7 = arith.constant 2.000000e-01 : f32
    %9 = vector.broadcast %cst_7 : f32 to vector<128x256xf32>
    %10 = arith.mulf %9, %6 : vector<128x256xf32>
    %11 = arith.select %8, %6, %10 : vector<128x256xi1>, vector<128x256xf32>
    %12 = vector.shape_cast %11 : vector<128x256xf32> to vector<1x128x256xf32>
    %13 = arith.truncf %12 : vector<1x128x256xf32> to vector<1x128x256xbf16>
    %c0_8 = arith.constant 0 : index
    %c0_9 = arith.constant 0 : index
    %c0_10 = arith.constant 0 : index
    %14 = vector.load %arg5[%c0_8, %c0_9, %c0_10] : memref<1x128x256xbf16, #tpu.memory_space<vmem>>, vector<1x128x256xbf16>
    tpu.vector_store %arg5[%c0_8, %c0_9, %c0_10], %13 {strides = array<i32>} : memref<1x128x256xbf16, #tpu.memory_space<vmem>>, vector<1x128x256xbf16>,
    %cst_11 = arith.constant dense<0.000000e+00> : vector<128xf32>
    %15 = vector.multi_reduction <add>, %11, %cst_11 [1] : vector<128x256xf32> to vector<128xf32>
    %16 = vector.shape_cast %15 : vector<128xf32> to vector<128x1xf32>
    %cst_12 = arith.constant dense<0xFF800000> : vector<128xf32>
    %17 = vector.multi_reduction <maximumf>, %11, %cst_12 [1] : vector<128x256xf32> to vector<128xf32>
    %18 = vector.shape_cast %17 : vector<128xf32> to vector<128x1xf32>
    %c0_i32 = arith.constant 0 : i32
    %19 = arith.cmpi eq, %arg1, %c0_i32 : i32
    %20 = arith.extui %19 : i1 to i32
    %c0_i32_13 = arith.constant 0 : i32
    %21 = arith.cmpi ne, %20, %c0_i32_13 : i32
    scf.if %21 {
      %25 = vector.shape_cast %16 : vector<128x1xf32> to vector<1x128x1xf32>
      %c0_16 = arith.constant 0 : index
      %c0_17 = arith.constant 0 : index
      %c0_18 = arith.constant 0 : index
      %26 = vector.load %arg6[%c0_16, %c0_17, %c0_18] : memref<1x128x1xf32, #tpu.memory_space<vmem>>, vector<1x128x1xf32>
      tpu.vector_store %arg6[%c0_16, %c0_17, %c0_18], %25 {strides = array<i32>} : memref<1x128x1xf32, #tpu.memory_space<vmem>>, vector<1x128x1xf32>,
      %27 = vector.shape_cast %18 : vector<128x1xf32> to vector<1x128x1xf32>
      %c0_19 = arith.constant 0 : index
      %c0_20 = arith.constant 0 : index
      %c0_21 = arith.constant 0 : index
      %28 = vector.load %arg7[%c0_19, %c0_20, %c0_21] : memref<1x128x1xf32, #tpu.memory_space<vmem>>, vector<1x128x1xf32>
      tpu.vector_store %arg7[%c0_19, %c0_20, %c0_21], %27 {strides = array<i32>} : memref<1x128x1xf32, #tpu.memory_space<vmem>>, vector<1x128x1xf32>,
    } else {
    }
    %c0_i32_14 = arith.constant 0 : i32
    %22 = arith.cmpi sgt, %arg1, %c0_i32_14 : i32
    %23 = arith.extui %22 : i1 to i32
    %c0_i32_15 = arith.constant 0 : i32
    %24 = arith.cmpi ne, %23, %c0_i32_15 : i32
    scf.if %24 {
      %c0_16 = arith.constant 0 : index
      %c0_17 = arith.constant 0 : index
      %c0_18 = arith.constant 0 : index
      %25 = vector.load %arg6[%c0_16, %c0_17, %c0_18] : memref<1x128x1xf32, #tpu.memory_space<vmem>>, vector<1x128x1xf32>
      %26 = vector.shape_cast %16 : vector<128x1xf32> to vector<1x128x1xf32>
      %27 = arith.addf %25, %26 : vector<1x128x1xf32>
      %c0_19 = arith.constant 0 : index
      %c0_20 = arith.constant 0 : index
      %c0_21 = arith.constant 0 : index
      %28 = vector.load %arg6[%c0_19, %c0_20, %c0_21] : memref<1x128x1xf32, #tpu.memory_space<vmem>>, vector<1x128x1xf32>
      tpu.vector_store %arg6[%c0_19, %c0_20, %c0_21], %27 {strides = array<i32>} : memref<1x128x1xf32, #tpu.memory_space<vmem>>, vector<1x128x1xf32>,
      %c0_22 = arith.constant 0 : index
      %c0_23 = arith.constant 0 : index
      %c0_24 = arith.constant 0 : index
      %29 = vector.load %arg7[%c0_22, %c0_23, %c0_24] : memref<1x128x1xf32, #tpu.memory_space<vmem>>, vector<1x128x1xf32>
      %30 = vector.shape_cast %18 : vector<128x1xf32> to vector<1x128x1xf32>
      %31 = arith.maximumf %29, %30 : vector<1x128x1xf32>
      %c0_25 = arith.constant 0 : index
      %c0_26 = arith.constant 0 : index
      %c0_27 = arith.constant 0 : index
      %32 = vector.load %arg7[%c0_25, %c0_26, %c0_27] : memref<1x128x1xf32, #tpu.memory_space<vmem>>, vector<1x128x1xf32>
      tpu.vector_store %arg7[%c0_25, %c0_26, %c0_27], %31 {strides = array<i32>} : memref<1x128x1xf32, #tpu.memory_space<vmem>>, vector<1x128x1xf32>,
    } else {
    }
    return
  }
  func.func @transform_0(%arg0: i32, %arg1: i32) -> (i32, i32, i32) {
    %c0_i32 = arith.constant 0 : i32
    %c0_i32_0 = arith.constant 0 : i32
    return %arg0, %c0_i32, %arg1 : i32, i32, i32
  }
  func.func @transform_1(%arg0: i32, %arg1: i32) -> (i32, i32) {
    %c0_i32 = arith.constant 0 : i32
    %c0_i32_0 = arith.constant 0 : i32
    %c0_i32_1 = arith.constant 0 : i32
    return %c0_i32, %c0_i32_0 : i32, i32
  }
  func.func @transform_2(%arg0: i32, %arg1: i32) -> (i32, i32) {
    %c0_i32 = arith.constant 0 : i32
    %c0_i32_0 = arith.constant 0 : i32
    %c0_i32_1 = arith.constant 0 : i32
    return %c0_i32, %c0_i32_0 : i32, i32
  }
  func.func @transform_3(%arg0: i32, %arg1: i32) -> (i32, i32, i32) {
    %c0_i32 = arith.constant 0 : i32
    %c0_i32_0 = arith.constant 0 : i32
    return %arg0, %c0_i32, %arg1 : i32, i32, i32
  }
  func.func @transform_4(%arg0: i32, %arg1: i32) -> (i32, i32, i32) {
    %c0_i32 = arith.constant 0 : i32
    %c0_i32_0 = arith.constant 0 : i32
    %c0_i32_1 = arith.constant 0 : i32
    return %arg0, %c0_i32, %c0_i32_0 : i32, i32, i32
  }
  func.func @transform_5(%arg0: i32, %arg1: i32) -> (i32, i32, i32) {
    %c0_i32 = arith.constant 0 : i32
    %c0_i32_0 = arith.constant 0 : i32
    %c0_i32_1 = arith.constant 0 : i32
    return %arg0, %c0_i32, %c0_i32_0 : i32, i32, i32
  }
}

module attributes {stable_mosaic.version = 11 : i64} {
  func.func @_gated_conv_inorm_kernel(%arg0: i32, %arg1: i32, %arg2: i32, %arg3: memref<1x32x1024xbf16, #tpu.memory_space<vmem>>, %arg4: memref<1x32x32xbf16, #tpu.memory_space<vmem>>, %arg5: memref<1x32x1024xf32, #tpu.memory_space<vmem>>, %arg6: memref<32x1xf32, #tpu.memory_space<vmem>>, %arg7: memref<32x1xf32, #tpu.memory_space<vmem>>, %arg8: memref<32x1xf32, #tpu.memory_space<vmem>>, %arg9: memref<32x1xf32, #tpu.memory_space<vmem>>) attributes {dimension_semantics = [#tpu.dimension_semantics<parallel>, #tpu.dimension_semantics<arbitrary>, #tpu.dimension_semantics<arbitrary>], iteration_bounds = array<i64: 2, 2, 1>, scalar_prefetch = 0 : i64, scratch_operands = 4 : i64, tpu.core_type = #tpu.core_type<tc>, window_params = [{transform_indices = @transform_0, window_bounds = array<i64: 1, 32, 1024>}, {transform_indices = @transform_1, window_bounds = array<i64: 1, 32, 32>}, {transform_indices = @transform_2, window_bounds = array<i64: 1, 32, 1024>}]} {
    %c0 = arith.constant 0 : index
    %c0_0 = arith.constant 0 : index
    %c0_1 = arith.constant 0 : index
    %0 = vector.load %arg4[%c0, %c0_0, %c0_1] : memref<1x32x32xbf16, #tpu.memory_space<vmem>>, vector<1x32x32xbf16>
    %1 = vector.shape_cast %0 : vector<1x32x32xbf16> to vector<32x32xbf16>
    %c0_2 = arith.constant 0 : index
    %c0_3 = arith.constant 0 : index
    %c0_4 = arith.constant 0 : index
    %2 = vector.load %arg3[%c0_2, %c0_3, %c0_4] : memref<1x32x1024xbf16, #tpu.memory_space<vmem>>, vector<1x32x1024xbf16>
    %3 = vector.shape_cast %2 : vector<1x32x1024xbf16> to vector<32x1024xbf16>
    %cst = arith.constant dense<0.000000e+00> : vector<32x1024xf32>
    %4 = tpu.matmul %1, %3, %cst {dimension_numbers = #tpu.dot_dimension_numbers<[1], [0], [0], [1], [0, 0, 1, 1], [], []>} : vector<32x32xbf16>, vector<32x1024xbf16>, vector<32x1024xf32> -> vector<32x1024xf32>
    %c0_i32 = arith.constant 0 : i32
    %5 = arith.cmpi eq, %arg1, %c0_i32 : i32
    %c0_i32_5 = arith.constant 0 : i32
    %6 = arith.cmpi eq, %arg2, %c0_i32_5 : i32
    %7 = arith.andi %5, %6 : i1
    %8 = arith.extui %7 : i1 to i32
    %c0_i32_6 = arith.constant 0 : i32
    %9 = arith.cmpi ne, %8, %c0_i32_6 : i32
    scf.if %9 {
      %cst_13 = arith.constant 0.000000e+00 : f32
      %21 = vector.broadcast %cst_13 : f32 to vector<32x1xf32>
      %c0_14 = arith.constant 0 : index
      %c0_15 = arith.constant 0 : index
      %22 = vector.load %arg6[%c0_14, %c0_15] : memref<32x1xf32, #tpu.memory_space<vmem>>, vector<32x1xf32>
      tpu.vector_store %arg6[%c0_14, %c0_15], %21 {strides = array<i32>} : memref<32x1xf32, #tpu.memory_space<vmem>>, vector<32x1xf32>,
      %cst_16 = arith.constant 0.000000e+00 : f32
      %23 = vector.broadcast %cst_16 : f32 to vector<32x1xf32>
      %c0_17 = arith.constant 0 : index
      %c0_18 = arith.constant 0 : index
      %24 = vector.load %arg7[%c0_17, %c0_18] : memref<32x1xf32, #tpu.memory_space<vmem>>, vector<32x1xf32>
      tpu.vector_store %arg7[%c0_17, %c0_18], %23 {strides = array<i32>} : memref<32x1xf32, #tpu.memory_space<vmem>>, vector<32x1xf32>,
    } else {
    }
    %c0_i32_7 = arith.constant 0 : i32
    %10 = arith.cmpi eq, %arg1, %c0_i32_7 : i32
    %11 = arith.extui %10 : i1 to i32
    %c0_i32_8 = arith.constant 0 : i32
    %12 = arith.cmpi ne, %11, %c0_i32_8 : i32
    scf.if %12 {
      %c0_13 = arith.constant 0 : index
      %c0_14 = arith.constant 0 : index
      %21 = vector.load %arg6[%c0_13, %c0_14] : memref<32x1xf32, #tpu.memory_space<vmem>>, vector<32x1xf32>
      %cst_15 = arith.constant dense<0.000000e+00> : vector<32xf32>
      %22 = vector.multi_reduction <add>, %4, %cst_15 [1] : vector<32x1024xf32> to vector<32xf32>
      %23 = vector.shape_cast %22 : vector<32xf32> to vector<32x1xf32>
      %24 = arith.addf %21, %23 : vector<32x1xf32>
      %c0_16 = arith.constant 0 : index
      %c0_17 = arith.constant 0 : index
      %25 = vector.load %arg6[%c0_16, %c0_17] : memref<32x1xf32, #tpu.memory_space<vmem>>, vector<32x1xf32>
      tpu.vector_store %arg6[%c0_16, %c0_17], %24 {strides = array<i32>} : memref<32x1xf32, #tpu.memory_space<vmem>>, vector<32x1xf32>,
      %c0_18 = arith.constant 0 : index
      %c0_19 = arith.constant 0 : index
      %26 = vector.load %arg7[%c0_18, %c0_19] : memref<32x1xf32, #tpu.memory_space<vmem>>, vector<32x1xf32>
      %27 = arith.mulf %4, %4 : vector<32x1024xf32>
      %cst_20 = arith.constant dense<0.000000e+00> : vector<32xf32>
      %28 = vector.multi_reduction <add>, %27, %cst_20 [1] : vector<32x1024xf32> to vector<32xf32>
      %29 = vector.shape_cast %28 : vector<32xf32> to vector<32x1xf32>
      %30 = arith.addf %26, %29 : vector<32x1xf32>
      %c0_21 = arith.constant 0 : index
      %c0_22 = arith.constant 0 : index
      %31 = vector.load %arg7[%c0_21, %c0_22] : memref<32x1xf32, #tpu.memory_space<vmem>>, vector<32x1xf32>
      tpu.vector_store %arg7[%c0_21, %c0_22], %30 {strides = array<i32>} : memref<32x1xf32, #tpu.memory_space<vmem>>, vector<32x1xf32>,
    } else {
    }
    %c1_i32 = arith.constant 1 : i32
    %13 = arith.cmpi eq, %arg1, %c1_i32 : i32
    %c0_i32_9 = arith.constant 0 : i32
    %14 = arith.cmpi eq, %arg2, %c0_i32_9 : i32
    %15 = arith.andi %13, %14 : i1
    %16 = arith.extui %15 : i1 to i32
    %c0_i32_10 = arith.constant 0 : i32
    %17 = arith.cmpi ne, %16, %c0_i32_10 : i32
    scf.if %17 {
      %c0_13 = arith.constant 0 : index
      %c0_14 = arith.constant 0 : index
      %21 = vector.load %arg6[%c0_13, %c0_14] : memref<32x1xf32, #tpu.memory_space<vmem>>, vector<32x1xf32>
      %cst_15 = arith.constant 9.765625E-4 : f32
      %22 = vector.broadcast %cst_15 : f32 to vector<32x1xf32>
      %23 = arith.mulf %21, %22 : vector<32x1xf32>
      %c0_16 = arith.constant 0 : index
      %c0_17 = arith.constant 0 : index
      %24 = vector.load %arg7[%c0_16, %c0_17] : memref<32x1xf32, #tpu.memory_space<vmem>>, vector<32x1xf32>
      %cst_18 = arith.constant 9.765625E-4 : f32
      %25 = vector.broadcast %cst_18 : f32 to vector<32x1xf32>
      %26 = arith.mulf %24, %25 : vector<32x1xf32>
      %27 = arith.mulf %23, %23 : vector<32x1xf32>
      %28 = arith.subf %26, %27 : vector<32x1xf32>
      %cst_19 = arith.constant 0.000000e+00 : f32
      %29 = vector.broadcast %cst_19 : f32 to vector<32x1xf32>
      %30 = arith.maximumf %28, %29 : vector<32x1xf32>
      %c0_20 = arith.constant 0 : index
      %c0_21 = arith.constant 0 : index
      %31 = vector.load %arg8[%c0_20, %c0_21] : memref<32x1xf32, #tpu.memory_space<vmem>>, vector<32x1xf32>
      tpu.vector_store %arg8[%c0_20, %c0_21], %23 {strides = array<i32>} : memref<32x1xf32, #tpu.memory_space<vmem>>, vector<32x1xf32>,
      %cst_22 = arith.constant 9.99999974E-6 : f32
      %32 = vector.broadcast %cst_22 : f32 to vector<32x1xf32>
      %33 = arith.addf %30, %32 : vector<32x1xf32>
      %34 = math.rsqrt %33 : vector<32x1xf32>
      %c0_23 = arith.constant 0 : index
      %c0_24 = arith.constant 0 : index
      %35 = vector.load %arg9[%c0_23, %c0_24] : memref<32x1xf32, #tpu.memory_space<vmem>>, vector<32x1xf32>
      tpu.vector_store %arg9[%c0_23, %c0_24], %34 {strides = array<i32>} : memref<32x1xf32, #tpu.memory_space<vmem>>, vector<32x1xf32>,
    } else {
    }
    %c1_i32_11 = arith.constant 1 : i32
    %18 = arith.cmpi eq, %arg1, %c1_i32_11 : i32
    %19 = arith.extui %18 : i1 to i32
    %c0_i32_12 = arith.constant 0 : i32
    %20 = arith.cmpi ne, %19, %c0_i32_12 : i32
    scf.if %20 {
      %c0_13 = arith.constant 0 : index
      %c0_14 = arith.constant 0 : index
      %21 = vector.load %arg8[%c0_13, %c0_14] : memref<32x1xf32, #tpu.memory_space<vmem>>, vector<32x1xf32>
      %22 = vector.broadcast %21 : vector<32x1xf32> to vector<32x1024xf32>
      %23 = arith.subf %4, %22 : vector<32x1024xf32>
      %c0_15 = arith.constant 0 : index
      %c0_16 = arith.constant 0 : index
      %24 = vector.load %arg9[%c0_15, %c0_16] : memref<32x1xf32, #tpu.memory_space<vmem>>, vector<32x1xf32>
      %25 = vector.broadcast %24 : vector<32x1xf32> to vector<32x1024xf32>
      %26 = arith.mulf %23, %25 : vector<32x1024xf32>
      %27 = vector.shape_cast %26 : vector<32x1024xf32> to vector<1x32x1024xf32>
      %c0_17 = arith.constant 0 : index
      %c0_18 = arith.constant 0 : index
      %c0_19 = arith.constant 0 : index
      %28 = vector.load %arg5[%c0_17, %c0_18, %c0_19] : memref<1x32x1024xf32, #tpu.memory_space<vmem>>, vector<1x32x1024xf32>
      tpu.vector_store %arg5[%c0_17, %c0_18, %c0_19], %27 {strides = array<i32>} : memref<1x32x1024xf32, #tpu.memory_space<vmem>>, vector<1x32x1024xf32>,
    } else {
    }
    return
  }
  func.func @transform_0(%arg0: i32, %arg1: i32, %arg2: i32) -> (i32, i32, i32) {
    %c0_i32 = arith.constant 0 : i32
    %c0_i32_0 = arith.constant 0 : i32
    return %arg0, %c0_i32, %arg2 : i32, i32, i32
  }
  func.func @transform_1(%arg0: i32, %arg1: i32, %arg2: i32) -> (i32, i32, i32) {
    %c0_i32 = arith.constant 0 : i32
    %c0_i32_0 = arith.constant 0 : i32
    %c0_i32_1 = arith.constant 0 : i32
    return %arg0, %c0_i32, %c0_i32_0 : i32, i32, i32
  }
  func.func @transform_2(%arg0: i32, %arg1: i32, %arg2: i32) -> (i32, i32, i32) {
    %0 = arith.muli %arg2, %arg1 : i32
    %c0_i32 = arith.constant 0 : i32
    %c0_i32_0 = arith.constant 0 : i32
    return %arg0, %c0_i32, %0 : i32, i32, i32
  }
}

</mosaic_0001>

<bundles_post_ra>
// kernel: squeeze.3
= control target key start
LH: loop header
LB: loop body
LE: loop exit
PB: predicated region body
PF: predicated region fallthrough
CT: control target
= control target key end

     0   :  { %s395_s8 = smov 116   ;;  %s396_s9 = smov 120   ;;  %vm19_vm0 = vcmask 31744   ;;  %s514_s0 = inlined_call_operand.vmem [shape: bf16[2,128], index: 0, kind: input, shape index: {}]   ;;  %s515_s1 = inlined_call_operand.vmem [shape: bf16[2,32,4], index: 1, kind: output, shape index: {}]  }
   0x1   :  { %v14_v0 = vld [vmem:[%s514_s0] sm:$0x1]  ;;  %s394_s0 = smov 124   ;;  %s397_s10 = smov 112  }
   0x2   :  { %v15_v1 = vunpack.c.l.bf16 %v14_v0  ;;  %s398_s11 = smov 108   ;;  %s399_s12 = smov 104  }
   0x3   :  { %s400_s13 = smov 100   ;;  %s401_s14 = smov 96  }
   0x4   :  { %17 = vst [vmem:[#allocation1] sm:$0x3] %v15_v1  ;;  %s402_s15 = smov 92   ;;  %s403_s16 = smov 88  }
   0x5   :  { %s404_s17 = smov 84   ;;  %s405_s18 = smov 80  }
   0x6   :  { %s406_s19 = smov 76   ;;  %s407_s20 = smov 72  }
   0x7   :  { %s408_s21 = smov 68   ;;  %s409_s22 = smov 64  }
   0x8   :  { %s410_s23 = smov 60   ;;  %s411_s24 = smov 56  }
   0x9   :  { %s412_s25 = smov 52   ;;  %s413_s26 = smov 48  }
   0xa   :  { %s414_s27 = smov 44   ;;  %s415_s28 = smov 40  }
   0xb   :  { %v23_v2 = vld [vmem:[#allocation1] sm:$0x3]   ;;  %s416_s29 = smov 36   ;;  %s417_s30 = smov 32  }
   0xc   :  { %v39_v3 = vld [vmem:[#allocation1] sm:$0x3]   ;;  %24 = vrot.lane.b32.xlu0 %v23_v2, %s394_s0  ;;  %s418_s2 = smov 28   ;;  %s419_s3 = smov 24  }
   0xd   :  { %40 = vrot.lane.b32.xlu1 %v39_v3, %s395_s8  ;;  %v31_v4 = vld [vmem:[#allocation1] sm:$0x3]   ;;  %s420_s4 = smov 20   ;;  %s421_s5 = smov 16  }
   0xe   :  { %v47_v5 = vld [vmem:[#allocation1] sm:$0x3]   ;;  %s422_s6 = smov 12   ;;  %s423_s7 = smov 8  }
   0xf   :  { %v55_v6 = vld [vmem:[#allocation1] sm:$0x3]   ;;  %s424_s0 = smov 4  }
  0x10   :  { %32 = vrot.lane.b32.xlu0 %v31_v4, %s396_s9  ;;  %v63_v7 = vld [vmem:[#allocation1] sm:$0x3]  }
  0x11   :  { %48 = vrot.lane.b32.xlu1 %v47_v5, %s397_s10  ;;  %v71_v8 = vld [vmem:[#allocation1] sm:$0x3]  }
  0x12   :  { %v79_v9 = vld [vmem:[#allocation1] sm:$0x3]  }
  0x13   :  { %v18_v10 = vld [vmem:[#allocation1] sm:$0x3]  }
  0x14   :  { %56 = vrot.lane.b32.xlu0 %v55_v6, %s398_s11  ;;  %20 = vst.msk [vmem:[#allocation0] sm:$0x1] %vm19_vm0, %v18_v10   ;;  %22 = vst.msk [vmem:[#allocation0 + $0x1f] sm:$0x2] %vm19_vm0, %v18_v10   ;;  %v87_v11 = vld [vmem:[#allocation1] sm:$0x3]  }
  0x15   :  { %64 = vrot.lane.b32.xlu1 %v63_v7, %s399_s12  ;;  %v95_v12 = vld [vmem:[#allocation1] sm:$0x3]  }
  0x16   :  { %v103_v13 = vld [vmem:[#allocation1] sm:$0x3]  }
  0x17   :  { %v111_v14 = vld [vmem:[#allocation1] sm:$0x3]  }
  0x18   :  { %72 = vrot.lane.b32.xlu0 %v71_v8, %s400_s13  ;;  %v119_v15 = vld [vmem:[#allocation1] sm:$0x3]  }
  0x19   :  { %80 = vrot.lane.b32.xlu1 %v79_v9, %s401_s14  ;;  %v127_v16 = vld [vmem:[#allocation1] sm:$0x3]  }
  0x1a   :  { %v135_v17 = vld [vmem:[#allocation1] sm:$0x3]  }
  0x1b   :  { %v143_v18 = vld [vmem:[#allocation1] sm:$0x3]  }
  0x1c   :  { %88 = vrot.lane.b32.xlu0 %v87_v11, %s402_s15  ;;  %v151_v19 = vld [vmem:[#allocation1] sm:$0x3]  }
  0x1d   :  { %96 = vrot.lane.b32.xlu1 %v95_v12, %s403_s16  ;;  %v159_v20 = vld [vmem:[#allocation1] sm:$0x3]  }
  0x1e   :  { %v167_v21 = vld [vmem:[#allocation1] sm:$0x3]  }
  0x1f   :  { %v175_v22 = vld [vmem:[#allocation1] sm:$0x3]  }
  0x20   :  { %104 = vrot.lane.b32.xlu0 %v103_v13, %s404_s17  ;;  %v183_v23 = vld [vmem:[#allocation1] sm:$0x3]  }
  0x21   :  { %112 = vrot.lane.b32.xlu1 %v111_v14, %s405_s18  ;;  %v191_v24 = vld [vmem:[#allocation1] sm:$0x3]  }
  0x22   :  { %v199_v25 = vld [vmem:[#allocation1] sm:$0x3]  }
  0x23   :  { %v207_v26 = vld [vmem:[#allocation1] sm:$0x3]  }
  0x24   :  { %120 = vrot.lane.b32.xlu0 %v119_v15, %s406_s19  ;;  %v215_v27 = vld [vmem:[#allocation1] sm:$0x3]  }
  0x25   :  { %128 = vrot.lane.b32.xlu1 %v127_v16, %s407_s20  ;;  %v223_v28 = vld [vmem:[#allocation1] sm:$0x3]  }
  0x26   :  { %v231_v29 = vld [vmem:[#allocation1] sm:$0x3]  }
  0x27   :  { %v239_v30 = vld [vmem:[#allocation1] sm:$0x3]  }
  0x28   :  { %136 = vrot.lane.b32.xlu0 %v135_v17, %s408_s21  ;;  %v247_v31 = vld [vmem:[#allocation1] sm:$0x3]  }
  0x29   :  { %144 = vrot.lane.b32.xlu1 %v143_v18, %s409_s22  ;;  %v255_v32 = vld [vmem:[#allocation1] sm:$0x3]  }
  0x2a   :  { %v263_v33 = vld [vmem:[#allocation1] sm:$0x3]  }
  0x2c   :  { %152 = vrot.lane.b32.xlu0 %v151_v19, %s410_s23 }
  0x2d   :  { %160 = vrot.lane.b32.xlu1 %v159_v20, %s411_s24 }
  0x30   :  { %168 = vrot.lane.b32.xlu0 %v167_v21, %s412_s25 }
  0x31   :  { %176 = vrot.lane.b32.xlu1 %v175_v22, %s413_s26 }
  0x34   :  { %184 = vrot.lane.b32.xlu0 %v183_v23, %s414_s27 }
  0x35   :  { %192 = vrot.lane.b32.xlu1 %v191_v24, %s415_s28 }
  0x38   :  { %200 = vrot.lane.b32.xlu0 %v199_v25, %s416_s29 }
  0x39   :  { %208 = vrot.lane.b32.xlu1 %v207_v26, %s417_s30 }
  0x3c   :  { %216 = vrot.lane.b32.xlu0 %v215_v27, %s418_s2 }
  0x3d   :  { %224 = vrot.lane.b32.xlu1 %v223_v28, %s419_s3 }
  0x40   :  { %232 = vrot.lane.b32.xlu0 %v231_v29, %s420_s4 }
  0x41   :  { %240 = vrot.lane.b32.xlu1 %v239_v30, %s421_s5 }
  0x44   :  { %248 = vrot.lane.b32.xlu0 %v247_v31, %s422_s6 }
  0x45   :  { %256 = vrot.lane.b32.xlu1 %v255_v32, %s423_s7 }
  0x48   :  { %264 = vrot.lane.b32.xlu0 %v263_v33, %s424_s0 }
  0x7e   :  { %v25_v34 = vpop.permute.xlu0 %24  }
  0x7f   :  { %v41_v35 = vpop.permute.xlu1 %40   ;;  %28 = vst.msk [vmem:[#allocation0 + $0x1] sm:$0x1] %vm19_vm0, %v25_v34   ;;  %30 = vst.msk [vmem:[#allocation0 + $0x20] sm:$0x2] %vm19_vm0, %v25_v34  }
  0x80   :  { %44 = vst.msk [vmem:[#allocation0 + $0x3] sm:$0x1] %vm19_vm0, %v41_v35   ;;  %46 = vst.msk [vmem:[#allocation0 + $0x22] sm:$0x2] %vm19_vm0, %v41_v35  }
  0x82   :  { %v33_v36 = vpop.permute.xlu0 %32  }
  0x83   :  { %v49_v37 = vpop.permute.xlu1 %48   ;;  %36 = vst.msk [vmem:[#allocation0 + $0x2] sm:$0x1] %vm19_vm0, %v33_v36   ;;  %38 = vst.msk [vmem:[#allocation0 + $0x21] sm:$0x2] %vm19_vm0, %v33_v36  }
  0x84   :  { %52 = vst.msk [vmem:[#allocation0 + $0x4] sm:$0x1] %vm19_vm0, %v49_v37   ;;  %54 = vst.msk [vmem:[#allocation0 + $0x23] sm:$0x2] %vm19_vm0, %v49_v37  }
  0x86   :  { %v57_v38 = vpop.permute.xlu0 %56  }
  0x87   :  { %v65_v39 = vpop.permute.xlu1 %64   ;;  %60 = vst.msk [vmem:[#allocation0 + $0x5] sm:$0x1] %vm19_vm0, %v57_v38   ;;  %62 = vst.msk [vmem:[#allocation0 + $0x24] sm:$0x2] %vm19_vm0, %v57_v38  }
  0x88   :  { %68 = vst.msk [vmem:[#allocation0 + $0x6] sm:$0x1] %vm19_vm0, %v65_v39   ;;  %70 = vst.msk [vmem:[#allocation0 + $0x25] sm:$0x2] %vm19_vm0, %v65_v39  }
  0x8a   :  { %v73_v40 = vpop.permute.xlu0 %72  }
  0x8b   :  { %v81_v41 = vpop.permute.xlu1 %80   ;;  %76 = vst.msk [vmem:[#allocation0 + $0x7] sm:$0x1] %vm19_vm0, %v73_v40   ;;  %78 = vst.msk [vmem:[#allocation0 + $0x26] sm:$0x2] %vm19_vm0, %v73_v40  }
  0x8c   :  { %84 = vst.msk [vmem:[#allocation0 + $0x8] sm:$0x1] %vm19_vm0, %v81_v41   ;;  %86 = vst.msk [vmem:[#allocation0 + $0x27] sm:$0x2] %vm19_vm0, %v81_v41  }
  0x8e   :  { %v89_v42 = vpop.permute.xlu0 %88  }
  0x8f   :  { %v97_v43 = vpop.permute.xlu1 %96   ;;  %92 = vst.msk [vmem:[#allocation0 + $0x9] sm:$0x1] %vm19_vm0, %v89_v42   ;;  %94 = vst.msk [vmem:[#allocation0 + $0x28] sm:$0x2] %vm19_vm0, %v89_v42  }
  0x90   :  { %100 = vst.msk [vmem:[#allocation0 + $0xa] sm:$0x1] %vm19_vm0, %v97_v43   ;;  %102 = vst.msk [vmem:[#allocation0 + $0x29] sm:$0x2] %vm19_vm0, %v97_v43  }
  0x92   :  { %v105_v44 = vpop.permute.xlu0 %104   ;;  %v275_v52 = vld [vmem:[#allocation0] sm:$0xff] }
  0x93   :  { %v113_v45 = vpop.permute.xlu1 %112   ;;  %108 = vst.msk [vmem:[#allocation0 + $0xb] sm:$0x1] %vm19_vm0, %v105_v44   ;;  %110 = vst.msk [vmem:[#allocation0 + $0x2a] sm:$0x2] %vm19_vm0, %v105_v44   ;;  %v300_v53 = vld [vmem:[#allocation0 + $0x20] sm:$0xff] }
  0x94   :  { %116 = vst.msk [vmem:[#allocation0 + $0xc] sm:$0x1] %vm19_vm0, %v113_v45   ;;  %118 = vst.msk [vmem:[#allocation0 + $0x2b] sm:$0x2] %vm19_vm0, %v113_v45  }
  0x96   :  { %v121_v46 = vpop.permute.xlu0 %120  }
  0x97   :  { %v129_v47 = vpop.permute.xlu1 %128   ;;  %124 = vst.msk [vmem:[#allocation0 + $0xd] sm:$0x1] %vm19_vm0, %v121_v46   ;;  %126 = vst.msk [vmem:[#allocation0 + $0x2c] sm:$0x2] %vm19_vm0, %v121_v46  }
  0x98   :  { %132 = vst.msk [vmem:[#allocation0 + $0xe] sm:$0x1] %vm19_vm0, %v129_v47   ;;  %134 = vst.msk [vmem:[#allocation0 + $0x2d] sm:$0x2] %vm19_vm0, %v129_v47  }
  0x9a   :  { %v137_v48 = vpop.permute.xlu0 %136  }
  0x9b   :  { %v145_v49 = vpop.permute.xlu1 %144   ;;  %140 = vst.msk [vmem:[#allocation0 + $0xf] sm:$0x1] %vm19_vm0, %v137_v48   ;;  %142 = vst.msk [vmem:[#allocation0 + $0x2e] sm:$0x2] %vm19_vm0, %v137_v48  }
  0x9c   :  { %148 = vst.msk [vmem:[#allocation0 + $0x10] sm:$0x1] %vm19_vm0, %v145_v49   ;;  %150 = vst.msk [vmem:[#allocation0 + $0x2f] sm:$0x2] %vm19_vm0, %v145_v49  }
  0x9e   :  { %v153_v50 = vpop.permute.xlu0 %152  }
  0x9f   :  { %v161_v51 = vpop.permute.xlu1 %160   ;;  %156 = vst.msk [vmem:[#allocation0 + $0x11] sm:$0x1] %vm19_vm0, %v153_v50   ;;  %158 = vst.msk [vmem:[#allocation0 + $0x30] sm:$0x2] %vm19_vm0, %v153_v50  }
  0xa0   :  { %164 = vst.msk [vmem:[#allocation0 + $0x12] sm:$0x1] %vm19_vm0, %v161_v51   ;;  %166 = vst.msk [vmem:[#allocation0 + $0x31] sm:$0x2] %vm19_vm0, %v161_v51  }
  0xa2   :  { %v280_v54 = vld [vmem:[#allocation0 + $0x8] sm:$0xff]  ;;  %v169_v56 = vpop.permute.xlu0 %168  }
  0xa3   :  { %v307_v55 = vld [vmem:[#allocation0 + $0x28] sm:$0xff]  ;;  %v177_v57 = vpop.permute.xlu1 %176   ;;  %v343_v58 = vpack.c.bf16 %v280_v54, %v275_v52  ;;  %172 = vst.msk [vmem:[#allocation0 + $0x13] sm:$0x1] %vm19_vm0, %v169_v56   ;;  %174 = vst.msk [vmem:[#allocation0 + $0x32] sm:$0x2] %vm19_vm0, %v169_v56  }
  0xa4   :  { %v353_v59 = vpack.c.bf16 %v307_v55, %v300_v53  ;;  %180 = vst.msk [vmem:[#allocation0 + $0x14] sm:$0x1] %vm19_vm0, %v177_v57   ;;  %182 = vst.msk [vmem:[#allocation0 + $0x33] sm:$0x2] %vm19_vm0, %v177_v57  }
  0xa5   :  { %344 = vst [vmem:[%s515_s1] sm:$0xff] %v343_v58  }
  0xa6   :  { %361 = vst [vmem:[%s515_s1 + $0x10] sm:$0xff] %v353_v59   ;;  %v185_v60 = vpop.permute.xlu0 %184  }
  0xa7   :  { %v193_v61 = vpop.permute.xlu1 %192   ;;  %188 = vst.msk [vmem:[#allocation0 + $0x15] sm:$0x1] %vm19_vm0, %v185_v60   ;;  %190 = vst.msk [vmem:[#allocation0 + $0x34] sm:$0x2] %vm19_vm0, %v185_v60  }
  0xa8   :  { %196 = vst.msk [vmem:[#allocation0 + $0x16] sm:$0x1] %vm19_vm0, %v193_v61   ;;  %198 = vst.msk [vmem:[#allocation0 + $0x35] sm:$0x2] %vm19_vm0, %v193_v61  }
  0xaa   :  { %v201_v62 = vpop.permute.xlu0 %200  }
  0xab   :  { %v209_v63 = vpop.permute.xlu1 %208   ;;  %204 = vst.msk [vmem:[#allocation0 + $0x17] sm:$0x1] %vm19_vm0, %v201_v62   ;;  %206 = vst.msk [vmem:[#allocation0 + $0x36] sm:$0x2] %vm19_vm0, %v201_v62  }
  0xac   :  { %212 = vst.msk [vmem:[#allocation0 + $0x18] sm:$0x1] %vm19_vm0, %v209_v63   ;;  %214 = vst.msk [vmem:[#allocation0 + $0x37] sm:$0x2] %vm19_vm0, %v209_v63  }
  0xae   :  { %v217_v0 = vpop.permute.xlu0 %216  }
  0xaf   :  { %v225_v1 = vpop.permute.xlu1 %224   ;;  %220 = vst.msk [vmem:[#allocation0 + $0x19] sm:$0x1] %vm19_vm0, %v217_v0   ;;  %222 = vst.msk [vmem:[#allocation0 + $0x38] sm:$0x2] %vm19_vm0, %v217_v0  }
  0xb0   :  { %228 = vst.msk [vmem:[#allocation0 + $0x1a] sm:$0x1] %vm19_vm0, %v225_v1   ;;  %230 = vst.msk [vmem:[#allocation0 + $0x39] sm:$0x2] %vm19_vm0, %v225_v1  }
  0xb2   :  { %v233_v2 = vpop.permute.xlu0 %232   ;;  %v286_v7 = vld [vmem:[#allocation0 + $0x10] sm:$0xff] }
  0xb3   :  { %v241_v3 = vpop.permute.xlu1 %240   ;;  %236 = vst.msk [vmem:[#allocation0 + $0x1b] sm:$0x1] %vm19_vm0, %v233_v2   ;;  %238 = vst.msk [vmem:[#allocation0 + $0x3a] sm:$0x2] %vm19_vm0, %v233_v2   ;;  %v314_v8 = vld [vmem:[#allocation0 + $0x30] sm:$0xff] }
  0xb4   :  { %244 = vst.msk [vmem:[#allocation0 + $0x1c] sm:$0x1] %vm19_vm0, %v241_v3   ;;  %246 = vst.msk [vmem:[#allocation0 + $0x3b] sm:$0x2] %vm19_vm0, %v241_v3  }
  0xb6   :  { %v249_v4 = vpop.permute.xlu0 %248  }
  0xb7   :  { %v257_v5 = vpop.permute.xlu1 %256   ;;  %252 = vst.msk [vmem:[#allocation0 + $0x1d] sm:$0x1] %vm19_vm0, %v249_v4   ;;  %254 = vst.msk [vmem:[#allocation0 + $0x3c] sm:$0x2] %vm19_vm0, %v249_v4  }
  0xb8   :  { %260 = vst.msk [vmem:[#allocation0 + $0x1e] sm:$0x1] %vm19_vm0, %v257_v5   ;;  %262 = vst.msk [vmem:[#allocation0 + $0x3d] sm:$0x2] %vm19_vm0, %v257_v5  }
  0xba   :  { %v265_v6 = vpop.permute.xlu0 %264  }
  0xbb   :  { %268 = vst.msk [vmem:[#allocation0 + $0x1f] sm:$0x1] %vm19_vm0, %v265_v6   ;;  %270 = vst.msk [vmem:[#allocation0 + $0x3e] sm:$0x2] %vm19_vm0, %v265_v6  }
  0xc2   :  { %v293_v9 = vld [vmem:[#allocation0 + $0x18] sm:$0xff] }
  0xc3   :  { %v321_v10 = vld [vmem:[#allocation0 + $0x38] sm:$0xff]  ;;  %v348_v11 = vpack.c.bf16 %v293_v9, %v286_v7 }
  0xc4   :  { %v358_v12 = vpack.c.bf16 %v321_v10, %v314_v8 }
  0xc5   :  { %360 = vst [vmem:[%s515_s1 + $0x8] sm:$0xff] %v348_v11  }
  0xc6   :  { %362 = vst [vmem:[%s515_s1 + $0x18] sm:$0xff] %v358_v12  }

// kernel: squeeze.2
= control target key start
LH: loop header
LB: loop body
LE: loop exit
PB: predicated region body
PF: predicated region fallthrough
CT: control target
= control target key end

     0   :  { %s354_s8 = smov 116   ;;  %s355_s9 = smov 120   ;;  %vm7_vm0 = vcmask 31744   ;;  %s653_s0 = inlined_call_operand.vmem [shape: f32[2,128], index: 0, kind: input, shape index: {}]   ;;  %s654_s1 = inlined_call_operand.vmem [shape: f32[2,32,4], index: 1, kind: output, shape index: {}]  }
   0x1   :  { %v4_v0 = vld [vmem:[%s653_s0] sm:$0x3]  ;;  %s353_s0 = smov 124   ;;  %s356_s10 = smov 112  }
   0x2   :  { %5 = vst [vmem:[#allocation0] sm:$0x3] %v4_v0  ;;  %s357_s11 = smov 108   ;;  %s358_s12 = smov 104  }
   0x3   :  { %s359_s13 = smov 100   ;;  %s360_s14 = smov 96  }
   0x4   :  { %s361_s15 = smov 92   ;;  %s362_s16 = smov 88  }
   0x5   :  { %s363_s17 = smov 84   ;;  %s364_s18 = smov 80  }
   0x6   :  { %s365_s19 = smov 76   ;;  %s366_s20 = smov 72  }
   0x7   :  { %s367_s21 = smov 68   ;;  %s368_s22 = smov 64  }
   0x8   :  { %s369_s23 = smov 60   ;;  %s370_s24 = smov 56  }
   0x9   :  { %v11_v1 = vld [vmem:[#allocation0] sm:$0x3]   ;;  %s371_s25 = smov 52   ;;  %s372_s26 = smov 48  }
   0xa   :  { %v27_v2 = vld [vmem:[#allocation0] sm:$0x3]   ;;  %12 = vrot.lane.b32.xlu0 %v11_v1, %s353_s0  ;;  %s373_s27 = smov 44   ;;  %s374_s28 = smov 40  }
   0xb   :  { %28 = vrot.lane.b32.xlu1 %v27_v2, %s354_s8  ;;  %v19_v3 = vld [vmem:[#allocation0] sm:$0x3]   ;;  %s375_s29 = smov 36   ;;  %s376_s30 = smov 32  }
   0xc   :  { %v35_v4 = vld [vmem:[#allocation0] sm:$0x3]   ;;  %s377_s6 = smov 28   ;;  %s378_s7 = smov 24  }
   0xd   :  { %v43_v5 = vld [vmem:[#allocation0] sm:$0x3]   ;;  %s379_s0 = smov 20   ;;  %s380_s8 = smov 16  }
   0xe   :  { %20 = vrot.lane.b32.xlu0 %v19_v3, %s355_s9  ;;  %v51_v6 = vld [vmem:[#allocation0] sm:$0x3]   ;;  %s381_s9 = smov 12  }
   0xf   :  { %36 = vrot.lane.b32.xlu1 %v35_v4, %s356_s10  ;;  %v59_v7 = vld [vmem:[#allocation0] sm:$0x3]   ;;  %s382_s10 = smov 8  }
  0x10   :  { %v67_v8 = vld [vmem:[#allocation0] sm:$0x3]  }
  0x11   :  { %v75_v9 = vld [vmem:[#allocation0] sm:$0x3]  }
  0x12   :  { %44 = vrot.lane.b32.xlu0 %v43_v5, %s357_s11  ;;  %v83_v10 = vld [vmem:[#allocation0] sm:$0x3]   ;;  %s383_s11 = smov 4  }
  0x13   :  { %52 = vrot.lane.b32.xlu1 %v51_v6, %s358_s12  ;;  %v91_v11 = vld [vmem:[#allocation0] sm:$0x3]  }
  0x14   :  { %v99_v12 = vld [vmem:[#allocation0] sm:$0x3]  }
  0x15   :  { %v107_v13 = vld [vmem:[#allocation0] sm:$0x3]  }
  0x16   :  { %60 = vrot.lane.b32.xlu0 %v59_v7, %s359_s13  ;;  %v115_v14 = vld [vmem:[#allocation0] sm:$0x3]  }
  0x17   :  { %68 = vrot.lane.b32.xlu1 %v67_v8, %s360_s14  ;;  %v123_v15 = vld [vmem:[#allocation0] sm:$0x3]  }
  0x18   :  { %v131_v16 = vld [vmem:[#allocation0] sm:$0x3]  }
  0x19   :  { %v139_v17 = vld [vmem:[#allocation0] sm:$0x3]  }
  0x1a   :  { %76 = vrot.lane.b32.xlu0 %v75_v9, %s361_s15  ;;  %v147_v18 = vld [vmem:[#allocation0] sm:$0x3]  }
  0x1b   :  { %84 = vrot.lane.b32.xlu1 %v83_v10, %s362_s16  ;;  %v155_v19 = vld [vmem:[#allocation0] sm:$0x3]  }
  0x1c   :  { %v163_v20 = vld [vmem:[#allocation0] sm:$0x3]  }
  0x1d   :  { %v171_v21 = vld [vmem:[#allocation0] sm:$0x3]  }
  0x1e   :  { %92 = vrot.lane.b32.xlu0 %v91_v11, %s363_s17  ;;  %v179_v22 = vld [vmem:[#allocation0] sm:$0x3]  }
  0x1f   :  { %100 = vrot.lane.b32.xlu1 %v99_v12, %s364_s18  ;;  %v187_v23 = vld [vmem:[#allocation0] sm:$0x3]  }
  0x20   :  { %v195_v24 = vld [vmem:[#allocation0] sm:$0x3]  }
  0x21   :  { %v203_v25 = vld [vmem:[#allocation0] sm:$0x3]  }
  0x22   :  { %108 = vrot.lane.b32.xlu0 %v107_v13, %s365_s19  ;;  %v211_v26 = vld [vmem:[#allocation0] sm:$0x3]  }
  0x23   :  { %116 = vrot.lane.b32.xlu1 %v115_v14, %s366_s20  ;;  %v6_v27 = vld [vmem:[#allocation0] sm:$0x3]  }
  0x24   :  { %8 = vst.msk [vmem:[%s654_s1] sm:$0x1] %vm7_vm0, %v6_v27   ;;  %259 = vst.msk [vmem:[%s654_s1 + $0x1f] sm:$0x2] %vm7_vm0, %v6_v27   ;;  %v219_v28 = vld [vmem:[#allocation0] sm:$0x3]  }
  0x25   :  { %v227_v29 = vld [vmem:[#allocation0] sm:$0x3]  }
  0x26   :  { %124 = vrot.lane.b32.xlu0 %v123_v15, %s367_s21  ;;  %v235_v30 = vld [vmem:[#allocation0] sm:$0x3]  }
  0x27   :  { %132 = vrot.lane.b32.xlu1 %v131_v16, %s368_s22  ;;  %v243_v31 = vld [vmem:[#allocation0] sm:$0x3]  }
  0x28   :  { %v251_v32 = vld [vmem:[#allocation0] sm:$0x3]  }
  0x2a   :  { %140 = vrot.lane.b32.xlu0 %v139_v17, %s369_s23 }
  0x2b   :  { %148 = vrot.lane.b32.xlu1 %v147_v18, %s370_s24 }
  0x2e   :  { %156 = vrot.lane.b32.xlu0 %v155_v19, %s371_s25 }
  0x2f   :  { %164 = vrot.lane.b32.xlu1 %v163_v20, %s372_s26 }
  0x32   :  { %172 = vrot.lane.b32.xlu0 %v171_v21, %s373_s27 }
  0x33   :  { %180 = vrot.lane.b32.xlu1 %v179_v22, %s374_s28 }
  0x36   :  { %188 = vrot.lane.b32.xlu0 %v187_v23, %s375_s29 }
  0x37   :  { %196 = vrot.lane.b32.xlu1 %v195_v24, %s376_s30 }
  0x3a   :  { %204 = vrot.lane.b32.xlu0 %v203_v25, %s377_s6 }
  0x3b   :  { %212 = vrot.lane.b32.xlu1 %v211_v26, %s378_s7 }
  0x3e   :  { %220 = vrot.lane.b32.xlu0 %v219_v28, %s379_s0 }
  0x3f   :  { %228 = vrot.lane.b32.xlu1 %v227_v29, %s380_s8 }
  0x42   :  { %236 = vrot.lane.b32.xlu0 %v235_v30, %s381_s9 }
  0x43   :  { %244 = vrot.lane.b32.xlu1 %v243_v31, %s382_s10 }
  0x46   :  { %252 = vrot.lane.b32.xlu0 %v251_v32, %s383_s11 }
  0x7c   :  { %v13_v33 = vpop.permute.xlu0 %12  }
  0x7d   :  { %v29_v34 = vpop.permute.xlu1 %28   ;;  %260 = vst.msk [vmem:[%s654_s1 + $0x1] sm:$0x1] %vm7_vm0, %v13_v33   ;;  %261 = vst.msk [vmem:[%s654_s1 + $0x20] sm:$0x2] %vm7_vm0, %v13_v33  }
  0x7e   :  { %264 = vst.msk [vmem:[%s654_s1 + $0x3] sm:$0x1] %vm7_vm0, %v29_v34   ;;  %265 = vst.msk [vmem:[%s654_s1 + $0x22] sm:$0x2] %vm7_vm0, %v29_v34  }
  0x80   :  { %v21_v35 = vpop.permute.xlu0 %20  }
  0x81   :  { %v37_v36 = vpop.permute.xlu1 %36   ;;  %262 = vst.msk [vmem:[%s654_s1 + $0x2] sm:$0x1] %vm7_vm0, %v21_v35   ;;  %263 = vst.msk [vmem:[%s654_s1 + $0x21] sm:$0x2] %vm7_vm0, %v21_v35  }
  0x82   :  { %266 = vst.msk [vmem:[%s654_s1 + $0x4] sm:$0x1] %vm7_vm0, %v37_v36   ;;  %267 = vst.msk [vmem:[%s654_s1 + $0x23] sm:$0x2] %vm7_vm0, %v37_v36  }
  0x84   :  { %v45_v37 = vpop.permute.xlu0 %44  }
  0x85   :  { %v53_v38 = vpop.permute.xlu1 %52   ;;  %268 = vst.msk [vmem:[%s654_s1 + $0x5] sm:$0x1] %vm7_vm0, %v45_v37   ;;  %269 = vst.msk [vmem:[%s654_s1 + $0x24] sm:$0x2] %vm7_vm0, %v45_v37  }
  0x86   :  { %270 = vst.msk [vmem:[%s654_s1 + $0x6] sm:$0x1] %vm7_vm0, %v53_v38   ;;  %271 = vst.msk [vmem:[%s654_s1 + $0x25] sm:$0x2] %vm7_vm0, %v53_v38  }
  0x88   :  { %v61_v39 = vpop.permute.xlu0 %60  }
  0x89   :  { %v69_v40 = vpop.permute.xlu1 %68   ;;  %272 = vst.msk [vmem:[%s654_s1 + $0x7] sm:$0x1] %vm7_vm0, %v61_v39   ;;  %273 = vst.msk [vmem:[%s654_s1 + $0x26] sm:$0x2] %vm7_vm0, %v61_v39  }
  0x8a   :  { %274 = vst.msk [vmem:[%s654_s1 + $0x8] sm:$0x1] %vm7_vm0, %v69_v40   ;;  %275 = vst.msk [vmem:[%s654_s1 + $0x27] sm:$0x2] %vm7_vm0, %v69_v40  }
  0x8c   :  { %v77_v41 = vpop.permute.xlu0 %76  }
  0x8d   :  { %v85_v42 = vpop.permute.xlu1 %84   ;;  %276 = vst.msk [vmem:[%s654_s1 + $0x9] sm:$0x1] %vm7_vm0, %v77_v41   ;;  %277 = vst.msk [vmem:[%s654_s1 + $0x28] sm:$0x2] %vm7_vm0, %v77_v41  }
  0x8e   :  { %278 = vst.msk [vmem:[%s654_s1 + $0xa] sm:$0x1] %vm7_vm0, %v85_v42   ;;  %279 = vst.msk [vmem:[%s654_s1 + $0x29] sm:$0x2] %vm7_vm0, %v85_v42  }
  0x90   :  { %v93_v43 = vpop.permute.xlu0 %92  }
  0x91   :  { %v101_v44 = vpop.permute.xlu1 %100   ;;  %280 = vst.msk [vmem:[%s654_s1 + $0xb] sm:$0x1] %vm7_vm0, %v93_v43   ;;  %281 = vst.msk [vmem:[%s654_s1 + $0x2a] sm:$0x2] %vm7_vm0, %v93_v43  }
  0x92   :  { %282 = vst.msk [vmem:[%s654_s1 + $0xc] sm:$0x1] %vm7_vm0, %v101_v44   ;;  %283 = vst.msk [vmem:[%s654_s1 + $0x2b] sm:$0x2] %vm7_vm0, %v101_v44  }
  0x94   :  { %v109_v45 = vpop.permute.xlu0 %108  }
  0x95   :  { %v117_v46 = vpop.permute.xlu1 %116   ;;  %284 = vst.msk [vmem:[%s654_s1 + $0xd] sm:$0x1] %vm7_vm0, %v109_v45   ;;  %285 = vst.msk [vmem:[%s654_s1 + $0x2c] sm:$0x2] %vm7_vm0, %v109_v45  }
  0x96   :  { %286 = vst.msk [vmem:[%s654_s1 + $0xe] sm:$0x1] %vm7_vm0, %v117_v46   ;;  %287 = vst.msk [vmem:[%s654_s1 + $0x2d] sm:$0x2] %vm7_vm0, %v117_v46  }
  0x98   :  { %v125_v47 = vpop.permute.xlu0 %124  }
  0x99   :  { %v133_v48 = vpop.permute.xlu1 %132   ;;  %288 = vst.msk [vmem:[%s654_s1 + $0xf] sm:$0x1] %vm7_vm0, %v125_v47   ;;  %289 = vst.msk [vmem:[%s654_s1 + $0x2e] sm:$0x2] %vm7_vm0, %v125_v47  }
  0x9a   :  { %290 = vst.msk [vmem:[%s654_s1 + $0x10] sm:$0x1] %vm7_vm0, %v133_v48   ;;  %291 = vst.msk [vmem:[%s654_s1 + $0x2f] sm:$0x2] %vm7_vm0, %v133_v48  }
  0x9c   :  { %v141_v49 = vpop.permute.xlu0 %140  }
  0x9d   :  { %v149_v50 = vpop.permute.xlu1 %148   ;;  %292 = vst.msk [vmem:[%s654_s1 + $0x11] sm:$0x1] %vm7_vm0, %v141_v49   ;;  %293 = vst.msk [vmem:[%s654_s1 + $0x30] sm:$0x2] %vm7_vm0, %v141_v49  }
  0x9e   :  { %294 = vst.msk [vmem:[%s654_s1 + $0x12] sm:$0x1] %vm7_vm0, %v149_v50   ;;  %295 = vst.msk [vmem:[%s654_s1 + $0x31] sm:$0x2] %vm7_vm0, %v149_v50  }
  0xa0   :  { %v157_v51 = vpop.permute.xlu0 %156  }
  0xa1   :  { %v165_v52 = vpop.permute.xlu1 %164   ;;  %296 = vst.msk [vmem:[%s654_s1 + $0x13] sm:$0x1] %vm7_vm0, %v157_v51   ;;  %297 = vst.msk [vmem:[%s654_s1 + $0x32] sm:$0x2] %vm7_vm0, %v157_v51  }
  0xa2   :  { %298 = vst.msk [vmem:[%s654_s1 + $0x14] sm:$0x1] %vm7_vm0, %v165_v52   ;;  %299 = vst.msk [vmem:[%s654_s1 + $0x33] sm:$0x2] %vm7_vm0, %v165_v52  }
  0xa4   :  { %v173_v53 = vpop.permute.xlu0 %172  }
  0xa5   :  { %v181_v54 = vpop.permute.xlu1 %180   ;;  %300 = vst.msk [vmem:[%s654_s1 + $0x15] sm:$0x1] %vm7_vm0, %v173_v53   ;;  %301 = vst.msk [vmem:[%s654_s1 + $0x34] sm:$0x2] %vm7_vm0, %v173_v53  }
  0xa6   :  { %302 = vst.msk [vmem:[%s654_s1 + $0x16] sm:$0x1] %vm7_vm0, %v181_v54   ;;  %303 = vst.msk [vmem:[%s654_s1 + $0x35] sm:$0x2] %vm7_vm0, %v181_v54  }
  0xa8   :  { %v189_v55 = vpop.permute.xlu0 %188  }
  0xa9   :  { %v197_v56 = vpop.permute.xlu1 %196   ;;  %304 = vst.msk [vmem:[%s654_s1 + $0x17] sm:$0x1] %vm7_vm0, %v189_v55   ;;  %305 = vst.msk [vmem:[%s654_s1 + $0x36] sm:$0x2] %vm7_vm0, %v189_v55  }
  0xaa   :  { %306 = vst.msk [vmem:[%s654_s1 + $0x18] sm:$0x1] %vm7_vm0, %v197_v56   ;;  %307 = vst.msk [vmem:[%s654_s1 + $0x37] sm:$0x2] %vm7_vm0, %v197_v56  }
  0xac   :  { %v205_v57 = vpop.permute.xlu0 %204  }
  0xad   :  { %v213_v58 = vpop.permute.xlu1 %212   ;;  %308 = vst.msk [vmem:[%s654_s1 + $0x19] sm:$0x1] %vm7_vm0, %v205_v57   ;;  %309 = vst.msk [vmem:[%s654_s1 + $0x38] sm:$0x2] %vm7_vm0, %v205_v57  }
  0xae   :  { %310 = vst.msk [vmem:[%s654_s1 + $0x1a] sm:$0x1] %vm7_vm0, %v213_v58   ;;  %311 = vst.msk [vmem:[%s654_s1 + $0x39] sm:$0x2] %vm7_vm0, %v213_v58  }
  0xb0   :  { %v221_v59 = vpop.permute.xlu0 %220  }
  0xb1   :  { %v229_v60 = vpop.permute.xlu1 %228   ;;  %312 = vst.msk [vmem:[%s654_s1 + $0x1b] sm:$0x1] %vm7_vm0, %v221_v59   ;;  %313 = vst.msk [vmem:[%s654_s1 + $0x3a] sm:$0x2] %vm7_vm0, %v221_v59  }
  0xb2   :  { %314 = vst.msk [vmem:[%s654_s1 + $0x1c] sm:$0x1] %vm7_vm0, %v229_v60   ;;  %315 = vst.msk [vmem:[%s654_s1 + $0x3b] sm:$0x2] %vm7_vm0, %v229_v60  }
  0xb4   :  { %v237_v61 = vpop.permute.xlu0 %236  }
  0xb5   :  { %v245_v62 = vpop.permute.xlu1 %244   ;;  %316 = vst.msk [vmem:[%s654_s1 + $0x1d] sm:$0x1] %vm7_vm0, %v237_v61   ;;  %317 = vst.msk [vmem:[%s654_s1 + $0x3c] sm:$0x2] %vm7_vm0, %v237_v61  }
  0xb6   :  { %318 = vst.msk [vmem:[%s654_s1 + $0x1e] sm:$0x1] %vm7_vm0, %v245_v62   ;;  %319 = vst.msk [vmem:[%s654_s1 + $0x3d] sm:$0x2] %vm7_vm0, %v245_v62  }
  0xb8   :  { %v253_v63 = vpop.permute.xlu0 %252  }
  0xb9   :  { %320 = vst.msk [vmem:[%s654_s1 + $0x1f] sm:$0x1] %vm7_vm0, %v253_v63   ;;  %321 = vst.msk [vmem:[%s654_s1 + $0x3e] sm:$0x2] %vm7_vm0, %v253_v63  }

// kernel: reconstruction_forward.2
= control target key start
LH: loop header
LB: loop body
LE: loop exit
PB: predicated region body
PF: predicated region fallthrough
CT: control target
= control target key end

     0   :  { %s1408_s18 = smov 0   ;;  %s1410_s19 = smov 0   ;;  %s1886_s0 = inlined_call_operand.vmem [shape: bf16[2,64,256], index: 0, kind: input, shape index: {}]   ;;  %s1887_s1 = inlined_call_operand.vmem [shape: bf16[128,64], index: 1, kind: input, shape index: {}]   ;;  %s1888_s2 = inlined_call_operand.vmem [shape: f32[128,1], index: 2, kind: input, shape index: {}]   ;;  %s1889_s3 = inlined_call_operand.vmem [shape: bf16[2,128,256], index: 3, kind: output, shape index: {0}]   ;;  %s1890_s4 = inlined_call_operand.vmem [shape: f32[2,128,1], index: 4, kind: output, shape index: {1}]   ;;  %s1891_s5 = inlined_call_operand.vmem [shape: f32[2,128,1], index: 5, kind: output, shape index: {2}]  }
   0x1   :  { %s1412_s20 = smov 0  }
   0x2 LB: > { %s28_s21 = sadd.s32 1, %s1371_s19  ;;  %p1227_p0 = scmp.ge.s32.totalorder %s1375_s20, 1  ;;  %s1375_s20 = sphi %s1412_s20, %s16_s20   ;;  %s1371_s19 = sphi %s1410_s19, %s1895_s19   ;;  %s1367_s18 = sphi %s1408_s18, %s1894_s18  }
   0x3   : > { %p30_p1 = scmp.ge.s32.totalorder %s28_s21, 2  ;;  %p213_p2 = scmp.lt.s32.totalorder %s1375_s20, 3 }
   0x5   : > { %s1897_s21 = smov (%p30_p1, %s28_s21), 0  ;;  %p214_p3 = pnand %p1227_p0, %p213_p2 }
   0x6   : > { %p260_p4 = scmp.lt.s32.totalorder (!%p214_p3), %s1367_s18, 1  ;;  %v1377_v0 = vmov (!%p214_p3), 0   ;;  %v316_v7 = vld [vmem:[%s1888_s2 + $0x10] sm:$0xff] (!%p214_p3)  ;;  %v314_v9 = vld [vmem:[%s1888_s2] sm:$0xff] (!%p214_p3)  ;;  %v317_v10 = vld [vmem:[%s1888_s2 + $0x18] sm:$0xff] (!%p214_p3)  ;;  %vm490_vm0 = vcmask (!%p214_p3), 523264  }
   0x7   : > { %217 = sbr.rel (%p214_p3) target bundleno = 465 (0x1d1), region = 32  ;;  %547 = vmatprep.mubr.bf16.mxu0 (!%p214_p3), %v1377_v0  ;;  %587 = vmatprep.mubr.bf16.mxu1 (!%p214_p3), %v1377_v0  ;;  %v315_v11 = vld [vmem:[%s1888_s2 + $0x8] sm:$0xff] (!%p214_p3)  ;;  %v1345_v13 = vld [vmem:[%s1887_s1] sm:$0xff] (!%p214_p3)   ;;  %v321_v17 = vld [vmem:[%s1888_s2 + $0x38] sm:$0xff] (!%p214_p3) }
   0x8   : > { %1332 = vset.pattern.permute.xlu1 (!%p214_p3), %v1377_v0  ;;  %1331 = vset.pattern.permute.xlu0 (!%p214_p3), %v1377_v0  ;;  %v1346_v14 = vld [vmem:[%s1887_s1 + $0x20] sm:$0xff] (!%p214_p3)   ;;  %v319_v15 = vld [vmem:[%s1888_s2 + $0x28] sm:$0xff] (!%p214_p3)  ;;  %v320_v18 = vld [vmem:[%s1888_s2 + $0x30] sm:$0xff] (!%p214_p3) }
   0x9   : > { %342 = vperm.xlu1 (!%p214_p3), %1332, %v316_v7   ;;  %332 = vperm.xlu0 (!%p214_p3), %1331, %v314_v9   ;;  %v318_v16 = vld [vmem:[%s1888_s2 + $0x20] sm:$0xff] (!%p214_p3)  ;;  %v1347_v19 = vld [vmem:[%s1887_s1 + $0x8] sm:$0xff] (!%p214_p3)   ;;  %v325_v23 = vld [vmem:[%s1888_s2 + $0x58] sm:$0xff] (!%p214_p3) }
   0xa   : > { %v1348_v20 = vld [vmem:[%s1887_s1 + $0x28] sm:$0xff] (!%p214_p3)   ;;  %v322_v22 = vld [vmem:[%s1888_s2 + $0x40] sm:$0xff] (!%p214_p3)  ;;  %v324_v24 = vld [vmem:[%s1888_s2 + $0x50] sm:$0xff] (!%p214_p3) }
   0xb   : > { %v323_v21 = vld [vmem:[%s1888_s2 + $0x48] sm:$0xff] (!%p214_p3)  ;;  %v1349_v25 = vld [vmem:[%s1887_s1 + $0x10] sm:$0xff] (!%p214_p3)   ;;  %v326_v28 = vld [vmem:[%s1888_s2 + $0x60] sm:$0xff] (!%p214_p3) }
   0xc   : > { %v1350_v26 = vld [vmem:[%s1887_s1 + $0x30] sm:$0xff] (!%p214_p3)   ;;  %v327_v27 = vld [vmem:[%s1888_s2 + $0x68] sm:$0xff] (!%p214_p3)  ;;  %v329_v29 = vld [vmem:[%s1888_s2 + $0x78] sm:$0xff] (!%p214_p3) }
   0xd   : > { %347 = vperm.xlu1 (!%p214_p3), %1332, %v317_v10   ;;  %337 = vperm.xlu0 (!%p214_p3), %1331, %v315_v11   ;;  %v328_v30 = vld [vmem:[%s1888_s2 + $0x70] sm:$0xff] (!%p214_p3)  ;;  %v1351_v31 = vld [vmem:[%s1887_s1 + $0x18] sm:$0xff] (!%p214_p3)  }
   0xe   : > { %s1899_s18 = smov (!%p260_p4, %s1367_s18), 1  ;;  %v1352_v32 = vld [vmem:[%s1887_s1 + $0x38] sm:$0xff]  }
   0xf   : > { %s1278_s22 = sshll.u32 %s1899_s18, 6  ;;  %s1535_s7 = sshll.u32 %s1899_s18, 7 }
  0x10   : > { %s267_s25 = scalar_lea.vmem %s1886_s0, %s1278_s22  ;;  %s1546_s10 = scalar_lea.vmem %s1889_s3, %s1535_s7 }
  0x11   : > { %v1333_v1 = vld [vmem:[%s267_s25 + $0x4] ss:$8 sps:$4 sm:$0xff]   ;;  %v1335_v2 = vld [vmem:[%s267_s25] ss:$8 sps:$4 sm:$0xff]   ;;  %v1336_v3 = vld [vmem:[%s267_s25 + $0x14] ss:$8 sps:$4 sm:$0xff]   ;;  %357 = vperm.xlu1 %1332, %v319_v15   ;;  %352 = vperm.xlu0 %1331, %v318_v16   ;;  %s1805_s12 = scalar_lea.vmem %s1890_s4, %s1535_s7  ;;  %s1815_s15 = scalar_lea.vmem %s1891_s5, %s1535_s7 }
  0x12   : > { %515 = vmatprep.subr.bf16.mxu0 %v1333_v1  ;;  %1298 = vmatprep.subr.bf16.mxu1 %v1333_v1  ;;  %v1338_v4 = vld [vmem:[%s267_s25 + $0x10] ss:$8 sps:$4 sm:$0xff]   ;;  %v1339_v5 = vld [vmem:[%s267_s25 + $0x24] ss:$8 sps:$4 sm:$0xff]   ;;  %v1341_v6 = vld [vmem:[%s267_s25 + $0x20] ss:$8 sps:$4 sm:$0xff]  }
  0x13   : > { %516 = vmatpush1.bf16.msra.mxu0 %v1335_v2  ;;  %1302 = vmatpush1.bf16.msra.mxu1 %v1335_v2  ;;  %v1342_v8 = vld [vmem:[%s267_s25 + $0x34] ss:$8 sps:$4 sm:$0xff]   ;;  %v1344_v12 = vld [vmem:[%s267_s25 + $0x30] ss:$8 sps:$4 sm:$0xff]  }
  0x14   : > { %517 = vmatprep.subr.bf16.mxu0 %v1336_v3  ;;  %1299 = vmatprep.subr.bf16.mxu1 %v1336_v3 }
  0x15   : > { %367 = vperm.xlu1 %1332, %v321_v17   ;;  %362 = vperm.xlu0 %1331, %v320_v18  }
  0x17   : > { %518 = vmatpush1.bf16.msra.mxu0 %v1338_v4  ;;  %1303 = vmatpush1.bf16.msra.mxu1 %v1338_v4 }
  0x18   : > { %519 = vmatprep.subr.bf16.mxu0 %v1339_v5  ;;  %1300 = vmatprep.subr.bf16.mxu1 %v1339_v5 }
  0x19   : > { %377 = vperm.xlu1 %1332, %v323_v21   ;;  %372 = vperm.xlu0 %1331, %v322_v22  }
  0x1b   : > { %520 = vmatpush1.bf16.msra.mxu0 %v1341_v6  ;;  %1304 = vmatpush1.bf16.msra.mxu1 %v1341_v6 }
  0x1c   : > { %521 = vmatprep.subr.bf16.mxu0 %v1342_v8  ;;  %1301 = vmatprep.subr.bf16.mxu1 %v1342_v8 }
  0x1d   : > { %387 = vperm.xlu1 %1332, %v325_v23   ;;  %382 = vperm.xlu0 %1331, %v324_v24  }
  0x1f   : > { %522 = vmatpush1.bf16.msra.mxu0 %v1344_v12  ;;  %1305 = vmatpush1.bf16.msra.mxu1 %v1344_v12 }
  0x21   : > { %397 = vperm.xlu1 %1332, %v327_v27   ;;  %392 = vperm.xlu0 %1331, %v326_v28  }
  0x22   : > { %1252 = vmatmul.mubr.msk.bf16.vlgmr.msra.gmra.mrb[0].mxu0 %vm490_vm0, %v1345_v13  ;;  %1256 = vmatmul.mubr.msk.bf16.vlgmr.msra.gmra.mrb[0].mxu1 %vm490_vm0, %v1346_v14 }
  0x23   : > { %557 = vmatprep.mubr.bf16.mxu0 %v1377_v0  ;;  %597 = vmatprep.mubr.bf16.mxu1 %v1377_v0 }
  0x25   : > { %407 = vperm.xlu1 %1332, %v329_v29   ;;  %402 = vperm.xlu0 %1331, %v328_v30  }
  0x2a   : > { %1253 = vmatmul.mubr.msk.bf16.gmra.mrb[4].mxu0 %vm490_vm0, %v1347_v19  ;;  %1257 = vmatmul.mubr.msk.bf16.gmra.mrb[4].mxu1 %vm490_vm0, %v1348_v20 }
  0x2b   : > { %567 = vmatprep.mubr.bf16.mxu0 %v1377_v0  ;;  %607 = vmatprep.mubr.bf16.mxu1 %v1377_v0 }
  0x32   : > { %1254 = vmatmul.mubr.msk.bf16.gmra.mrb[8].mxu0 %vm490_vm0, %v1349_v25  ;;  %1258 = vmatmul.mubr.msk.bf16.gmra.mrb[8].mxu1 %vm490_vm0, %v1350_v26 }
  0x33   : > { %577 = vmatprep.mubr.bf16.mxu0 %v1377_v0  ;;  %617 = vmatprep.mubr.bf16.mxu1 %v1377_v0 }
  0x3a   : > { %1255 = vmatmul.mubr.msk.bf16.gmra.mrb[12].mxu0 %vm490_vm0, %v1351_v31  ;;  %1259 = vmatmul.mubr.msk.bf16.gmra.mrb[12].mxu1 %vm490_vm0, %v1352_v32 }
  0x88   : > { %v333_v33 = vpop.permute.xlu0 %332  ;;  %v1522_v34 = vpop.permute.xlu1 %342 }
  0x8c   : > { %v338_v35 = vpop.permute.xlu0 %337  ;;  %v1524_v36 = vpop.permute.xlu1 %347 }
  0x90   : > { %v1526_v37 = vpop.permute.xlu0 %352  ;;  %v1528_v38 = vpop.permute.xlu1 %357 }
  0x94   : > { %v1530_v39 = vpop.permute.xlu0 %362  ;;  %v1532_v40 = vpop.permute.xlu1 %367 }
  0x98   : > { %v373_v41 = vpop.permute.xlu0 %372  ;;  %v378_v54 = vpop.permute.xlu1 %377 }
  0x9c   : > { %v383_v3 = vpop.permute.xlu0 %382  ;;  %v388_v32 = vpop.permute.xlu1 %387 }
  0xf5   : > { %v549_v42 = vpop.f32.mrb[0].mxu0  ;;  %v589_v43 = vpop.f32.mrb[0].mxu1 }
  0xf6   : > { %v550_v44 = vadd.f32 %v549_v42, %v333_v33  ;;  %v590_v45 = vadd.f32 %v589_v43, %v373_v41  ;;  %v551_v46 = vpop.f32.mrb[1].mxu0  ;;  %v591_v47 = vpop.f32.mrb[1].mxu1 }
  0xf7   : > { %v552_v48 = vadd.f32 %v551_v46, %v333_v33  ;;  %v592_v49 = vadd.f32 %v591_v47, %v373_v41  ;;  %v553_v50 = vpop.f32.mrb[2].mxu0  ;;  %v593_v51 = vpop.f32.mrb[2].mxu1 }
  0xf8   : > { %vm628_vm1 = vcmp.gt.f32.partialorder %v550_v44, 0.0  ;;  %v660_v52 = vmul.f32 0.2, %v550_v44  ;;  %vm644_vm2 = vcmp.gt.f32.partialorder %v590_v45, 0.0  ;;  %v676_v53 = vmul.f32 0.2, %v590_v45  ;;  %v393_v41 = vpop.permute.xlu0 %392 }
  0xf9   : > { %vm629_vm3 = vcmp.gt.f32.partialorder %v552_v48, 0.0  ;;  %v661_v55 = vmul.f32 0.2, %v552_v48  ;;  %vm645_vm4 = vcmp.gt.f32.partialorder %v592_v49, 0.0  ;;  %v677_v56 = vmul.f32 0.2, %v592_v49 }
  0xfa   : > { %v594_v57 = vadd.f32 %v593_v51, %v378_v54  ;;  %v555_v58 = vpop.f32.mrb[3].mxu0  ;;  %v595_v59 = vpop.f32.mrb[3].mxu1  ;;  %v1537_v60 = vsel %vm644_vm2, %v590_v45, %v676_v53  ;;  %v692_v63 = vsel %vm628_vm1, %v550_v44, %v660_v52  ;;  %v554_v1 = vadd.f32 %v553_v50, %v338_v35 }
  0xfb   : > { %v596_v61 = vadd.f32 %v595_v59, %v378_v54  ;;  %v1539_v62 = vsel %vm645_vm4, %v592_v49, %v677_v56  ;;  %v693_v0 = vsel %vm629_vm3, %v552_v48, %v661_v55  ;;  %v556_v4 = vadd.f32 %v555_v58, %v338_v35 }
  0xfc   : > { %v678_v2 = vmul.f32 0.2, %v594_v57  ;;  %vm646_vm5 = vcmp.gt.f32.partialorder %v594_v57, 0.0  ;;  %v860_v8 = vadd.f32 %v1539_v62, %v1537_v60  ;;  %v1290_v9 = vpack.c.bf16 %v1539_v62, %v1537_v60 }
  0xfd   : > { %vm647_vm6 = vcmp.gt.f32.partialorder %v596_v61, 0.0  ;;  %v679_v5 = vmul.f32 0.2, %v596_v61  ;;  %v559_v6 = vpop.f32.mrb[4].mxu0  ;;  %v599_v7 = vpop.f32.mrb[4].mxu1  ;;  %v836_v10 = vadd.f32 %v693_v0, %v692_v63  ;;  %v1282_v11 = vpack.c.bf16 %v693_v0, %v692_v63 }
  0xfe   : > { %v600_v12 = vadd.f32 %v599_v7, %v383_v3  ;;  %v601_v13 = vpop.f32.mrb[5].mxu1  ;;  %v561_v14 = vpop.f32.mrb[5].mxu0  ;;  %v884_v15 = vmax.f32 %v692_v63, %v693_v0  ;;  %861 = vadd.xlane.f32.xlu1 %v860_v8  ;;  %828 = vst [vmem:[%s1546_s10 + $0x40] sm:$0xff] %v1290_v9  ;;  %v1555_v19 = vsel %vm646_vm5, %v594_v57, %v678_v2  ;;  %v662_v21 = vmul.f32 0.2, %v554_v1 }
  0xff   : > { %v602_v16 = vadd.f32 %v601_v13, %v383_v3  ;;  %837 = vadd.xlane.f32.xlu0 %v836_v10  ;;  %820 = vst [vmem:[%s1546_s10] sm:$0xff] %v1282_v11  ;;  %v563_v17 = vpop.f32.mrb[6].mxu0  ;;  %v603_v18 = vpop.f32.mrb[6].mxu1  ;;  %v1558_v20 = vsel %vm647_vm6, %v596_v61, %v679_v5  ;;  %v1561_v22 = vadd.f32 %v559_v6, %v1522_v34  ;;  %vm630_vm7 = vcmp.gt.f32.partialorder %v554_v1, 0.0 }
 0x100   : > { %v663_v23 = vmul.f32 0.2, %v556_v4  ;;  %v1564_v24 = vadd.f32 %v561_v14, %v1522_v34  ;;  %v680_v25 = vmul.f32 0.2, %v600_v12  ;;  %v565_v27 = vpop.f32.mrb[7].mxu0  ;;  %v605_v28 = vpop.f32.mrb[7].mxu1  ;;  %v1291_v29 = vpack.c.bf16 %v1558_v20, %v1555_v19 }
 0x101   : > { %v681_v26 = vmul.f32 0.2, %v602_v16  ;;  %v863_v30 = vadd.f32 %v1558_v20, %v1555_v19  ;;  %vm631_vm8 = vcmp.gt.f32.partialorder %v556_v4, 0.0  ;;  %vm648_vm9 = vcmp.gt.f32.partialorder %v600_v12, 0.0 }
 0x102   : > { %vm649_vm10 = vcmp.gt.f32.partialorder %v602_v16, 0.0  ;;  %885 = vmax.xlane.f32.xlu1 %v884_v15  ;;  %v908_v31 = vmax.f32 %v1537_v60, %v1539_v62  ;;  %vm632_vm11 = vcmp.gt.f32.partialorder %v1561_v22, 0.0  ;;  %v664_v33 = vmul.f32 0.2, %v1561_v22  ;;  %829 = vst [vmem:[%s1546_s10 + $0x48] sm:$0xff] %v1291_v29 }
 0x103   : > { %v1575_v34 = vadd.f32 %v563_v17, %v1524_v36  ;;  %864 = vadd.xlane.f32.xlu0 %v863_v30  ;;  %v694_v35 = vsel %vm630_vm7, %v554_v1, %v662_v21  ;;  %vm633_vm12 = vcmp.gt.f32.partialorder %v1564_v24, 0.0  ;;  %v1580_v42 = vadd.f32 %v603_v18, %v388_v32  ;;  %v398_v1 = vpop.permute.xlu1 %397  ;;  %v403_v17 = vpop.permute.xlu0 %402 }
 0x104   : > { %v1583_v43 = vadd.f32 %v565_v27, %v1524_v36  ;;  %v1585_v44 = vadd.f32 %v605_v28, %v388_v32  ;;  %v695_v47 = vsel %vm631_vm8, %v556_v4, %v663_v23  ;;  %v911_v48 = vmax.f32 %v1555_v19, %v1558_v20 }
 0x105   : > { %v569_v45 = vpop.f32.mrb[8].mxu0  ;;  %v609_v46 = vpop.f32.mrb[8].mxu1  ;;  %v1591_v49 = vsel %vm648_vm9, %v600_v12, %v680_v25  ;;  %v1594_v50 = vsel %vm649_vm10, %v602_v16, %v681_v26  ;;  %v665_v51 = vmul.f32 0.2, %v1564_v24  ;;  %v1283_v54 = vpack.c.bf16 %v695_v47, %v694_v35 }
 0x106   : > { %v1598_v36 = vadd.f32 %v569_v45, %v1526_v37  ;;  %v571_v52 = vpop.f32.mrb[9].mxu0  ;;  %v611_v53 = vpop.f32.mrb[9].mxu1  ;;  %909 = vmax.xlane.f32.xlu1 %v908_v31  ;;  %v887_v55 = vmax.f32 %v694_v35, %v695_v47  ;;  %vm634_vm13 = vcmp.gt.f32.partialorder %v1575_v34, 0.0  ;;  %v1601_v56 = vadd.f32 %v609_v46, %v393_v41 }
 0x107   : > { %v573_v57 = vpop.f32.mrb[10].mxu0  ;;  %v613_v58 = vpop.f32.mrb[10].mxu1  ;;  %v839_v59 = vadd.f32 %v695_v47, %v694_v35  ;;  %v1292_v60 = vpack.c.bf16 %v1594_v50, %v1591_v49  ;;  %v666_v61 = vmul.f32 0.2, %v1575_v34  ;;  %v1607_v62 = vmul.f32 0.2, %v1580_v42 }
 0x108   : > { %v1610_v63 = vadd.f32 %v571_v52, %v1526_v37  ;;  %v1612_v0 = vadd.f32 %v611_v53, %v393_v41  ;;  %821 = vst [vmem:[%s1546_s10 + $0x8] sm:$0xff] %v1283_v54  ;;  %888 = vmax.xlane.f32.xlu0 %v887_v55  ;;  %vm650_vm14 = vcmp.gt.f32.partialorder %v1580_v42, 0.0  ;;  %vm635_vm15 = vcmp.gt.f32.partialorder %v1583_v43, 0.0  ;;  %v575_v6 = vpop.f32.mrb[11].mxu0  ;;  %v615_v7 = vpop.f32.mrb[11].mxu1 }
 0x109   : > { %v667_v2 = vmul.f32 0.2, %v1583_v43  ;;  %v1619_v3 = vmul.f32 0.2, %v1585_v44  ;;  %830 = vst [vmem:[%s1546_s10 + $0x50] sm:$0xff] %v1292_v60  ;;  %v1626_v37 = vadd.f32 %v573_v57, %v1528_v38  ;;  %v1628_v5 = vadd.f32 %v613_v58, %v398_v1 }
 0x10a   : > { %v1623_v4 = vmul.f32 0.2, %v1598_v36  ;;  %840 = vadd.xlane.f32.xlu1 %v839_v59  ;;  %v866_v8 = vadd.f32 %v1594_v50, %v1591_v49  ;;  %vm651_vm0 = vcmp.gt.f32.partialorder %v1585_v44, 0.0  ;;  %vm636_vm1 = vcmp.gt.f32.partialorder %v1598_v36, 0.0 }
 0x10b   : > { %v1635_v9 = vmul.f32 0.2, %v1601_v56  ;;  %v1638_v10 = vadd.f32 %v575_v6, %v1528_v38  ;;  %v696_v13 = vsel %vm632_vm11, %v1561_v22, %v664_v33  ;;  %v697_v14 = vsel %vm633_vm12, %v1564_v24, %v665_v51 }
 0x10c   : > { %vm637_vm2 = vcmp.gt.f32.partialorder %v1610_v63, 0.0  ;;  %v1648_v15 = vmul.f32 0.2, %v1610_v63  ;;  %v1651_v16 = vmul.f32 0.2, %v1612_v0  ;;  %v1653_v38 = vadd.f32 %v615_v7, %v398_v1  ;;  %912 = vmax.xlane.f32.xlu0 %v911_v48 }
 0x10d   : > { %v579_v11 = vpop.f32.mrb[12].mxu0  ;;  %v619_v12 = vpop.f32.mrb[12].mxu1  ;;  %vm652_vm3 = vcmp.gt.f32.partialorder %v1601_v56, 0.0  ;;  %vm653_vm4 = vcmp.gt.f32.partialorder %v1612_v0, 0.0  ;;  %v1658_v18 = vmul.f32 0.2, %v1626_v37  ;;  %v1669_v21 = vsel %vm634_vm13, %v1575_v34, %v666_v61 }
 0x10e   : > { %v1661_v19 = vmul.f32 0.2, %v1628_v5  ;;  %v1664_v20 = vmul.f32 0.2, %v1638_v10  ;;  %vm638_vm5 = vcmp.gt.f32.partialorder %v1626_v37, 0.0  ;;  %vm639_vm6 = vcmp.gt.f32.partialorder %v1638_v10, 0.0  ;;  %867 = vadd.xlane.f32.xlu1 %v866_v8 }
 0x10f   : > { %v1674_v22 = vadd.f32 %v579_v11, %v1530_v39  ;;  %v1676_v23 = vadd.f32 %v619_v12, %v403_v17  ;;  %v581_v24 = vpop.f32.mrb[13].mxu0  ;;  %v621_v25 = vpop.f32.mrb[13].mxu1  ;;  %v1284_v26 = vpack.c.bf16 %v697_v14, %v696_v13  ;;  %v842_v27 = vadd.f32 %v697_v14, %v696_v13 }
 0x110   : > { %vm654_vm7 = vcmp.gt.f32.partialorder %v1628_v5, 0.0  ;;  %v1680_v28 = vadd.f32 %v581_v24, %v1530_v39  ;;  %v1682_v29 = vadd.f32 %v621_v25, %v403_v17  ;;  %v583_v30 = vpop.f32.mrb[14].mxu0  ;;  %v623_v31 = vpop.f32.mrb[14].mxu1  ;;  %v890_v32 = vmax.f32 %v696_v13, %v697_v14 }
 0x111   : > { %v1687_v33 = vsel %vm635_vm15, %v1583_v43, %v667_v2  ;;  %vm655_vm8 = vcmp.gt.f32.partialorder %v1653_v38, 0.0  ;;  %v687_v34 = vmul.f32 0.2, %v1653_v38  ;;  %v672_v35 = vmul.f32 0.2, %v1674_v22  ;;  %822 = vst [vmem:[%s1546_s10 + $0x10] sm:$0xff] %v1284_v26  ;;  %843 = vadd.xlane.f32.xlu0 %v842_v27  ;;  %v408_v39 = vpop.permute.xlu1 %407 }
 0x112   : > { %v1693_v41 = vmul.f32 0.2, %v1676_v23  ;;  %vm640_vm9 = vcmp.gt.f32.partialorder %v1674_v22, 0.0  ;;  %vm641_vm10 = vcmp.gt.f32.partialorder %v1680_v28, 0.0  ;;  %v673_v45 = vmul.f32 0.2, %v1680_v28  ;;  %891 = vmax.xlane.f32.xlu1 %v890_v32 }
 0x113   : > { %v689_v43 = vmul.f32 0.2, %v1682_v29  ;;  %v1703_v46 = vadd.f32 %v583_v30, %v1532_v40  ;;  %v1705_v47 = vadd.f32 %v623_v31, %v408_v39  ;;  %v585_v48 = vpop.f32.mrb[15].mxu0  ;;  %v625_v51 = vpop.f32.mrb[15].mxu1  ;;  %v1285_v52 = vpack.c.bf16 %v1687_v33, %v1669_v21 }
 0x114   : > { %v845_v53 = vadd.f32 %v1687_v33, %v1669_v21  ;;  %v586_v54 = vadd.f32 %v585_v48, %v1532_v40  ;;  %v1712_v55 = vadd.f32 %v625_v51, %v408_v39  ;;  %v914_v57 = vmax.f32 %v1591_v49, %v1594_v50 }
 0x115   : > { %v1720_v58 = vsel %vm650_vm14, %v1580_v42, %v1607_v62  ;;  %vm642_vm13 = vcmp.gt.f32.partialorder %v1703_v46, 0.0  ;;  %v674_v59 = vmul.f32 0.2, %v1703_v46  ;;  %vm658_vm15 = vcmp.gt.f32.partialorder %v1705_v47, 0.0  ;;  %823 = vst [vmem:[%s1546_s10 + $0x18] sm:$0xff] %v1285_v52 }
 0x116   : > { %v690_v60 = vmul.f32 0.2, %v1705_v47  ;;  %846 = vadd.xlane.f32.xlu0 %v845_v53  ;;  %vm643_vm12 = vcmp.gt.f32.partialorder %v586_v54, 0.0  ;;  %v675_v40 = vmul.f32 0.2, %v586_v54  ;;  %vm659_vm11 = vcmp.gt.f32.partialorder %v1712_v55, 0.0  ;;  %915 = vmax.xlane.f32.xlu1 %v914_v57 }
 0x117   : > { %v691_v49 = vmul.f32 0.2, %v1712_v55  ;;  %v715_v42 = vsel %vm651_vm0, %v1585_v44, %v1619_v3  ;;  %v700_v50 = vsel %vm636_vm1, %v1598_v36, %v1623_v4  ;;  %v701_v61 = vsel %vm637_vm2, %v1610_v63, %v1648_v15 }
 0x118   : > { %v893_v62 = vmax.f32 %v1669_v21, %v1687_v33  ;;  %v1293_v1 = vpack.c.bf16 %v715_v42, %v1720_v58  ;;  %v869_v2 = vadd.f32 %v715_v42, %v1720_v58  ;;  %v1286_v6 = vpack.c.bf16 %v701_v61, %v700_v50 }
 0x119   : > { %v848_v7 = vadd.f32 %v701_v61, %v700_v50  ;;  %v716_v44 = vsel %vm652_vm3, %v1601_v56, %v1635_v9  ;;  %v717_v36 = vsel %vm653_vm4, %v1612_v0, %v1651_v16  ;;  %v917_v63 = vmax.f32 %v1720_v58, %v715_v42 }
 0x11a   : > { %v896_v3 = vmax.f32 %v700_v50, %v701_v61  ;;  %831 = vst [vmem:[%s1546_s10 + $0x58] sm:$0xff] %v1293_v1  ;;  %870 = vadd.xlane.f32.xlu0 %v869_v2  ;;  %824 = vst [vmem:[%s1546_s10 + $0x20] sm:$0xff] %v1286_v6  ;;  %v1294_v4 = vpack.c.bf16 %v717_v36, %v716_v44  ;;  %v872_v8 = vadd.f32 %v717_v36, %v716_v44  ;;  %vm936_vm1 = vcmask 7168  }
 0x11b   : > { %v702_v56 = vsel %vm638_vm5, %v1626_v37, %v1658_v18  ;;  %v703_v9 = vsel %vm639_vm6, %v1638_v10, %v1664_v20  ;;  %849 = vadd.xlane.f32.xlu1 %v848_v7  ;;  %v920_v12 = vmax.f32 %v716_v44, %v717_v36  ;;  %v718_v13 = vsel %vm654_vm7, %v1628_v5, %v1661_v19 }
 0x11c   : > { %v1287_v0 = vpack.c.bf16 %v703_v9, %v702_v56  ;;  %v851_v11 = vadd.f32 %v703_v9, %v702_v56  ;;  %832 = vst [vmem:[%s1546_s10 + $0x60] sm:$0xff] %v1294_v4  ;;  %v719_v37 = vsel %vm655_vm8, %v1653_v38, %v687_v34  ;;  %v704_v10 = vsel %vm640_vm9, %v1674_v22, %v672_v35 }
 0x11d   : > { %v705_v14 = vsel %vm641_vm10, %v1680_v28, %v673_v45  ;;  %v899_v15 = vmax.f32 %v702_v56, %v703_v9  ;;  %v1295_v16 = vpack.c.bf16 %v719_v37, %v718_v13  ;;  %v875_v17 = vadd.f32 %v719_v37, %v718_v13 }
 0x11e   : > { %825 = vst [vmem:[%s1546_s10 + $0x28] sm:$0xff] %v1287_v0  ;;  %v1288_v5 = vpack.c.bf16 %v705_v14, %v704_v10  ;;  %v854_v18 = vadd.f32 %v705_v14, %v704_v10  ;;  %894 = vmax.xlane.f32.xlu0 %v893_v62  ;;  %vm1892_vm14 = vcmp.gt.f32.partialorder %v1676_v23, 0.0  ;;  %vm1893_vm0 = vcmp.gt.f32.partialorder %v1682_v29, 0.0 }
 0x11f   : > { %v720_v38 = vsel %vm1892_vm14, %v1676_v23, %v1693_v41  ;;  %v721_v19 = vsel %vm1893_vm0, %v1682_v29, %v689_v43  ;;  %v923_v20 = vmax.f32 %v718_v13, %v719_v37  ;;  %v902_v21 = vmax.f32 %v704_v10, %v705_v14  ;;  %873 = vadd.xlane.f32.xlu1 %v872_v8 }
 0x120   : > { %833 = vst [vmem:[%s1546_s10 + $0x68] sm:$0xff] %v1295_v16  ;;  %826 = vst [vmem:[%s1546_s10 + $0x30] sm:$0xff] %v1288_v5  ;;  %v1296_v22 = vpack.c.bf16 %v721_v19, %v720_v38  ;;  %v878_v24 = vadd.f32 %v721_v19, %v720_v38  ;;  %v706_v25 = vsel %vm642_vm13, %v1703_v46, %v674_v59 }
 0x121   : > { %v707_v26 = vsel %vm643_vm12, %v586_v54, %v675_v40  ;;  %v926_v28 = vmax.f32 %v720_v38, %v721_v19  ;;  %v722_v29 = vsel %vm658_vm15, %v1705_v47, %v690_v60  ;;  %v723_v30 = vsel %vm659_vm11, %v1712_v55, %v691_v49 }
 0x122   : > { %v1289_v23 = vpack.c.bf16 %v707_v26, %v706_v25  ;;  %v857_v27 = vadd.f32 %v707_v26, %v706_v25  ;;  %834 = vst [vmem:[%s1546_s10 + $0x70] sm:$0xff] %v1296_v22  ;;  %v905_v31 = vmax.f32 %v706_v25, %v707_v26  ;;  %918 = vmax.xlane.f32.xlu0 %v917_v63 }
 0x123   : > { %v1297_v32 = vpack.c.bf16 %v723_v30, %v722_v29  ;;  %v881_v33 = vadd.f32 %v723_v30, %v722_v29  ;;  %v929_v34 = vmax.f32 %v722_v29, %v723_v30  ;;  %897 = vmax.xlane.f32.xlu1 %v896_v3 }
 0x124   : > { %827 = vst [vmem:[%s1546_s10 + $0x38] sm:$0xff] %v1289_v23 }
 0x125   : > { %835 = vst [vmem:[%s1546_s10 + $0x78] sm:$0xff] %v1297_v32 }
 0x126   : > { %852 = vadd.xlane.f32.xlu0 %v851_v11 }
 0x127   : > { %921 = vmax.xlane.f32.xlu1 %v920_v12 }
 0x12a   : > { %876 = vadd.xlane.f32.xlu0 %v875_v17 }
 0x12b   : > { %855 = vadd.xlane.f32.xlu1 %v854_v18 }
 0x12e   : > { %900 = vmax.xlane.f32.xlu0 %v899_v15 }
 0x12f   : > { %879 = vadd.xlane.f32.xlu1 %v878_v24 }
 0x132   : > { %924 = vmax.xlane.f32.xlu0 %v923_v20 }
 0x133   : > { %903 = vmax.xlane.f32.xlu1 %v902_v21 }
 0x136   : > { %858 = vadd.xlane.f32.xlu0 %v857_v27 }
 0x137   : > { %927 = vmax.xlane.f32.xlu1 %v926_v28 }
 0x13a   : > { %882 = vadd.xlane.f32.xlu0 %v881_v33 }
 0x13e   : > { %906 = vmax.xlane.f32.xlu0 %v905_v31 }
 0x142   : > { %930 = vmax.xlane.f32.xlu0 %v929_v34 }
 0x18b   : > { %v862_v35 = vpop.xlane.xlu1 %861 }
 0x18c   : > { %v838_v41 = vpop.xlane.xlu0 %837  ;;  %945 = vst.msk [vmem:[%s1805_s12 + $0x40] sm:$0xff] %vm936_vm1, %v862_v35 }
 0x18d   : > { %937 = vst.msk [vmem:[%s1805_s12] sm:$0xff] %vm936_vm1, %v838_v41 }
 0x18f   : > { %v886_v39 = vpop.xlane.xlu1 %885 }
 0x190   : > { %953 = vst.msk [vmem:[%s1815_s15] sm:$0xff] %vm936_vm1, %v886_v39  ;;  %v865_v45 = vpop.xlane.xlu0 %864 }
 0x191   : > { %946 = vst.msk [vmem:[%s1805_s12 + $0x48] sm:$0xff] %vm936_vm1, %v865_v45 }
 0x193   : > { %v910_v43 = vpop.xlane.xlu1 %909 }
 0x194   : > { %961 = vst.msk [vmem:[%s1815_s15 + $0x40] sm:$0xff] %vm936_vm1, %v910_v43 }
 0x195   : > { %v889_v46 = vpop.xlane.xlu0 %888 }
 0x196   : > { %954 = vst.msk [vmem:[%s1815_s15 + $0x8] sm:$0xff] %vm936_vm1, %v889_v46 }
 0x197   : > { %v841_v47 = vpop.xlane.xlu1 %840 }
 0x198   : > { %938 = vst.msk [vmem:[%s1805_s12 + $0x8] sm:$0xff] %vm936_vm1, %v841_v47 }
 0x199   : > { %v913_v48 = vpop.xlane.xlu0 %912 }
 0x19a   : > { %962 = vst.msk [vmem:[%s1815_s15 + $0x48] sm:$0xff] %vm936_vm1, %v913_v48 }
 0x19b   : > { %v868_v51 = vpop.xlane.xlu1 %867 }
 0x19c   : > { %947 = vst.msk [vmem:[%s1805_s12 + $0x50] sm:$0xff] %vm936_vm1, %v868_v51 }
 0x19e   : > { %v844_v52 = vpop.xlane.xlu0 %843 }
 0x19f   : > { %939 = vst.msk [vmem:[%s1805_s12 + $0x10] sm:$0xff] %vm936_vm1, %v844_v52  ;;  %v892_v53 = vpop.xlane.xlu1 %891 }
 0x1a0   : > { %955 = vst.msk [vmem:[%s1815_s15 + $0x10] sm:$0xff] %vm936_vm1, %v892_v53 }
 0x1a3   : > { %v847_v54 = vpop.xlane.xlu0 %846  ;;  %v916_v55 = vpop.xlane.xlu1 %915 }
 0x1a4   : > { %940 = vst.msk [vmem:[%s1805_s12 + $0x18] sm:$0xff] %vm936_vm1, %v847_v54  ;;  %963 = vst.msk [vmem:[%s1815_s15 + $0x50] sm:$0xff] %vm936_vm1, %v916_v55 }
 0x1a7   : > { %v871_v57 = vpop.xlane.xlu0 %870 }
 0x1a8   : > { %948 = vst.msk [vmem:[%s1805_s12 + $0x58] sm:$0xff] %vm936_vm1, %v871_v57  ;;  %v850_v58 = vpop.xlane.xlu1 %849 }
 0x1a9   : > { %941 = vst.msk [vmem:[%s1805_s12 + $0x20] sm:$0xff] %vm936_vm1, %v850_v58 }
 0x1ab   : > { %v895_v59 = vpop.xlane.xlu0 %894 }
 0x1ac   : > { %956 = vst.msk [vmem:[%s1815_s15 + $0x18] sm:$0xff] %vm936_vm1, %v895_v59  ;;  %v874_v60 = vpop.xlane.xlu1 %873 }
 0x1ad   : > { %949 = vst.msk [vmem:[%s1805_s12 + $0x60] sm:$0xff] %vm936_vm1, %v874_v60 }
 0x1af   : > { %v919_v40 = vpop.xlane.xlu0 %918 }
 0x1b0   : > { %964 = vst.msk [vmem:[%s1815_s15 + $0x58] sm:$0xff] %vm936_vm1, %v919_v40  ;;  %v898_v49 = vpop.xlane.xlu1 %897 }
 0x1b1   : > { %957 = vst.msk [vmem:[%s1815_s15 + $0x20] sm:$0xff] %vm936_vm1, %v898_v49 }
 0x1b3   : > { %v853_v42 = vpop.xlane.xlu0 %852 }
 0x1b4   : > { %942 = vst.msk [vmem:[%s1805_s12 + $0x28] sm:$0xff] %vm936_vm1, %v853_v42  ;;  %v922_v50 = vpop.xlane.xlu1 %921 }
 0x1b5   : > { %965 = vst.msk [vmem:[%s1815_s15 + $0x60] sm:$0xff] %vm936_vm1, %v922_v50 }
 0x1b7   : > { %v877_v61 = vpop.xlane.xlu0 %876 }
 0x1b8   : > { %950 = vst.msk [vmem:[%s1805_s12 + $0x68] sm:$0xff] %vm936_vm1, %v877_v61  ;;  %v856_v62 = vpop.xlane.xlu1 %855 }
 0x1b9   : > { %943 = vst.msk [vmem:[%s1805_s12 + $0x30] sm:$0xff] %vm936_vm1, %v856_v62 }
 0x1bb   : > { %v901_v1 = vpop.xlane.xlu0 %900 }
 0x1bc   : > { %958 = vst.msk [vmem:[%s1815_s15 + $0x28] sm:$0xff] %vm936_vm1, %v901_v1  ;;  %v880_v2 = vpop.xlane.xlu1 %879 }
 0x1bd   : > { %951 = vst.msk [vmem:[%s1805_s12 + $0x70] sm:$0xff] %vm936_vm1, %v880_v2 }
 0x1bf   : > { %v925_v6 = vpop.xlane.xlu0 %924 }
 0x1c0   : > { %966 = vst.msk [vmem:[%s1815_s15 + $0x68] sm:$0xff] %vm936_vm1, %v925_v6  ;;  %v904_v7 = vpop.xlane.xlu1 %903 }
 0x1c1   : > { %959 = vst.msk [vmem:[%s1815_s15 + $0x30] sm:$0xff] %vm936_vm1, %v904_v7 }
 0x1c3   : > { %v859_v44 = vpop.xlane.xlu0 %858 }
 0x1c4   : > { %944 = vst.msk [vmem:[%s1805_s12 + $0x38] sm:$0xff] %vm936_vm1, %v859_v44  ;;  %v928_v36 = vpop.xlane.xlu1 %927 }
 0x1c5   : > { %967 = vst.msk [vmem:[%s1815_s15 + $0x70] sm:$0xff] %vm936_vm1, %v928_v36 }
 0x1c7   : > { %v883_v63 = vpop.xlane.xlu0 %882 }
 0x1c8   : > { %952 = vst.msk [vmem:[%s1805_s12 + $0x78] sm:$0xff] %vm936_vm1, %v883_v63 }
 0x1cb   : > { %v907_v3 = vpop.xlane.xlu0 %906 }
 0x1cc   : > { %960 = vst.msk [vmem:[%s1815_s15 + $0x38] sm:$0xff] %vm936_vm1, %v907_v3 }
 0x1cf   : > { %v931_v4 = vpop.xlane.xlu0 %930 }
 0x1d0   : > { %968 = vst.msk [vmem:[%s1815_s15 + $0x78] sm:$0xff] %vm936_vm1, %v931_v4 }
 0x1d1 PF: > { %s16_s20 = sadd.s32 1, %s1375_s20   ;;  %s1894_s18 = smov %s1371_s19 }
 0x1d2   : > { %p13_p5 = scmp.ge.s32.totalorder %s16_s20, 4   ;;  %s1895_s19 = smov %s1897_s21 }
 0x1d4   :  { %15 = sbr.rel (!%p13_p5) target bundleno = 2 (0x2), region = 94 }

// kernel: reconstruction_forward.3
= control target key start
LH: loop header
LB: loop body
LE: loop exit
PB: predicated region body
PF: predicated region fallthrough
CT: control target
= control target key end

     0   :  { %s1158_s9 = smov 0   ;;  %s1160_s10 = smov 0   ;;  %s1544_s0 = inlined_call_operand.vmem [shape: bf16[2,32,1024], index: 0, kind: input, shape index: {}]   ;;  %s1545_s1 = inlined_call_operand.vmem [shape: bf16[2,32,32], index: 1, kind: input, shape index: {}]   ;;  %s1546_s2 = inlined_call_operand.vmem [shape: f32[2,32,1024], index: 2, kind: output, shape index: {}]  }
   0x1   :  { %s1162_s11 = smov 0   ;;  %s1164_s12 = smov 0  }
   0x2   :  { %s1166_s13 = smov 0  }
   0x3 LB: > { %s27_s14 = sadd.s32 1, %s1130_s11  ;;  %s31_s15 = sadd.s32 1, %s1134_s12  ;;  %s1138_s13 = sphi %s1166_s13, %s12_s13   ;;  %s1134_s12 = sphi %s1164_s12, %s1550_s12   ;;  %s1130_s11 = sphi %s1162_s11, %s1549_s11   ;;  %s1126_s10 = sphi %s1160_s10, %s1548_s10   ;;  %s1122_s9 = sphi %s1158_s9, %s1547_s9  }
   0x4   : > { %p29_p0 = scmp.ge.s32.totalorder %s27_s14, 2  ;;  %p1001_p1 = scmp.ge.s32.totalorder %s1138_s13, 1 }
   0x5   : > { %p152_p2 = scmp.lt.s32.totalorder %s1138_s13, 5 }
   0x6   : > { %s1552_s14 = smov (%p29_p0, %s27_s14), 0  ;;  %s1554_s15 = smov (!%p29_p0, %s31_s15), %s1134_s12 }
   0x7   : > { %p153_p3 = pnand %p1001_p1, %p152_p2  ;;  %p33_p4 = scmp.ge.s32.totalorder %s1554_s15, 2 }
   0x8   : > { %p189_p5 = scmp.lt.s32.totalorder (!%p153_p3), %s1126_s10, 1  ;;  %v1140_v0 = vmov (!%p153_p3), 0   ;;  %vm326_vm0 = vcmask (!%p153_p3), 261120   ;;  %p545_p6 = scmp.eq.s32.totalorder (!%p153_p3), %s1122_s9, 0 }
   0x9   : > { %s1556_s15 = smov (%p33_p4, %s1554_s15), 0  ;;  %156 = sbr.rel (%p153_p3) target bundleno = 633 (0x279), region = 28 }
   0xa   : > { %365 = vmatprep.mubr.bf16.mxu0 (!%p153_p3), %v1140_v0  ;;  %418 = vmatprep.mubr.bf16.mxu1 (!%p153_p3), %v1140_v0 }
  0x10   : > { %s1558_s10 = smov (!%p189_p5, %s1126_s10), 1  ;;  %vm551_vm1 = vcmask (%p545_p6), 7168  }
  0x11   : > { %s1040_s16 = sshll.u32 %s1558_s10, 7  ;;  %s1042_s17 = sshll.u32 %s1558_s10, 8 }
  0x12   : > { %s1195_s20 = scalar_lea.vmem %s1544_s0, %s1040_s16  ;;  %s1200_s23 = scalar_lea.vmem %s1546_s2, %s1042_s17 }
  0x13   : > { %v220_v1 = vld [vmem:[%s1195_s20] sm:$0xff]  ;;  %v221_v3 = vld [vmem:[%s1195_s20 + $0x8] sm:$0xff]  ;;  %s1041_s24 = sshll.u32 %s1558_s10, 4  ;;  %v222_v15 = vld [vmem:[%s1195_s20 + $0x10] sm:$0xff] }
  0x14   : > { %v224_v2 = vld [vmem:[%s1195_s20 + $0x20] sm:$0xff]  ;;  %v225_v5 = vld [vmem:[%s1195_s20 + $0x28] sm:$0xff]  ;;  %s1211_s27 = scalar_lea.vmem %s1545_s1, %s1041_s24  ;;  %v226_v17 = vld [vmem:[%s1195_s20 + $0x30] sm:$0xff] }
  0x15   : > { %v1011_v4 = vcombine.high %v220_v1, %v224_v2  ;;  %v1010_v6 = vcombine.low %v220_v1, %v224_v2  ;;  %v228_v7 = vld [vmem:[%s1195_s20 + $0x40] sm:$0xff]  ;;  %v1013_v9 = vcombine.high %v221_v3, %v225_v5  ;;  %v1012_v10 = vcombine.low %v221_v3, %v225_v5  ;;  %v229_v12 = vld [vmem:[%s1195_s20 + $0x48] sm:$0xff]  ;;  %v223_v18 = vld [vmem:[%s1195_s20 + $0x18] sm:$0xff] }
  0x16   : > { %v232_v8 = vld [vmem:[%s1195_s20 + $0x60] sm:$0xff]  ;;  %v233_v13 = vld [vmem:[%s1195_s20 + $0x68] sm:$0xff]  ;;  %v227_v19 = vld [vmem:[%s1195_s20 + $0x38] sm:$0xff]  ;;  %v1015_v21 = vcombine.high %v222_v15, %v226_v17  ;;  %v1014_v26 = vcombine.low %v222_v15, %v226_v17  ;;  %v1141_v3 = vmov (%p545_p6), 0.0  }
  0x17   : > { %v1019_v11 = vcombine.high %v228_v7, %v232_v8  ;;  %333 = vmatprep.subr.bf16.mxu0 %v1011_v4  ;;  %v1021_v14 = vcombine.high %v229_v12, %v233_v13  ;;  %386 = vmatprep.subr.bf16.mxu1 %v1013_v9  ;;  %v1018_v16 = vcombine.low %v228_v7, %v232_v8  ;;  %v1088_v23 = vld [vmem:[%s1211_s27] sm:$0xff]   ;;  %v230_v24 = vld [vmem:[%s1195_s20 + $0x50] sm:$0xff]  ;;  %v231_v27 = vld [vmem:[%s1195_s20 + $0x58] sm:$0xff] }
  0x18   : > { %334 = vmatpush1.bf16.msra.mxu0 %v1010_v6  ;;  %387 = vmatpush1.bf16.msra.mxu1 %v1012_v10  ;;  %v1020_v20 = vcombine.low %v229_v12, %v233_v13  ;;  %v1017_v22 = vcombine.high %v223_v18, %v227_v19  ;;  %v234_v25 = vld [vmem:[%s1195_s20 + $0x70] sm:$0xff]  ;;  %v235_v28 = vld [vmem:[%s1195_s20 + $0x78] sm:$0xff]  ;;  %v1016_v29 = vcombine.low %v223_v18, %v227_v19  ;;  %v1089_v34 = vld [vmem:[%s1211_s27 + $0x8] sm:$0xff]  }
  0x19   : > { %335 = vmatprep.subr.bf16.mxu0 %v1019_v11  ;;  %388 = vmatprep.subr.bf16.mxu1 %v1021_v14  ;;  %v1023_v30 = vcombine.high %v230_v24, %v234_v25  ;;  %v1025_v31 = vcombine.high %v231_v27, %v235_v28  ;;  %v1022_v32 = vcombine.low %v230_v24, %v234_v25 }
  0x1a   : > { %v1024_v33 = vcombine.low %v231_v27, %v235_v28  ;;  %552 = vst.msk [vmem:[#allocation2] sm:$0xff] (%p545_p6), %vm551_vm1, %v1141_v3  ;;  %553 = vst.msk [vmem:[#allocation2 + $0x8] sm:$0xff] (%p545_p6), %vm551_vm1, %v1141_v3 }
  0x1b   : > { %554 = vst.msk [vmem:[#allocation2 + $0x10] sm:$0xff] (%p545_p6), %vm551_vm1, %v1141_v3  ;;  %555 = vst.msk [vmem:[#allocation2 + $0x18] sm:$0xff] (%p545_p6), %vm551_vm1, %v1141_v3 }
  0x1c   : > { %336 = vmatpush1.bf16.msra.mxu0 %v1018_v16  ;;  %389 = vmatpush1.bf16.msra.mxu1 %v1020_v20  ;;  %556 = vst.msk [vmem:[#allocation3] sm:$0xff] (%p545_p6), %vm551_vm1, %v1141_v3  ;;  %557 = vst.msk [vmem:[#allocation3 + $0x8] sm:$0xff] (%p545_p6), %vm551_vm1, %v1141_v3 }
  0x1d   : > { %439 = vmatprep.subr.bf16.mxu0 %v1015_v21  ;;  %492 = vmatprep.subr.bf16.mxu1 %v1017_v22  ;;  %558 = vst.msk [vmem:[#allocation3 + $0x10] sm:$0xff] (%p545_p6), %vm551_vm1, %v1141_v3  ;;  %559 = vst.msk [vmem:[#allocation3 + $0x18] sm:$0xff] (%p545_p6), %vm551_vm1, %v1141_v3 }
  0x1f   : > { %1026 = vmatmul.mubr.msk.bf16.vlgmr.msra.gmra.mrb[0].mxu0 %vm326_vm0, %v1088_v23  ;;  %1028 = vmatmul.mubr.msk.bf16.vlgmr.msra.gmra.mrb[0].mxu1 %vm326_vm0, %v1088_v23 }
  0x20   : > { %440 = vmatpush1.bf16.msra.mxu0 %v1014_v26  ;;  %493 = vmatpush1.bf16.msra.mxu1 %v1016_v29 }
  0x21   : > { %375 = vmatprep.mubr.bf16.mxu0 %v1140_v0  ;;  %428 = vmatprep.mubr.bf16.mxu1 %v1140_v0 }
  0x22   : > { %441 = vmatprep.subr.bf16.mxu0 %v1023_v30  ;;  %494 = vmatprep.subr.bf16.mxu1 %v1025_v31 }
  0x24   : > { %442 = vmatpush1.bf16.msra.mxu0 %v1022_v32  ;;  %495 = vmatpush1.bf16.msra.mxu1 %v1024_v33 }
  0x27   : > { %1027 = vmatmul.mubr.msk.bf16.gmra.mrb[4].mxu0 %vm326_vm0, %v1089_v34  ;;  %1029 = vmatmul.mubr.msk.bf16.gmra.mrb[4].mxu1 %vm326_vm0, %v1089_v34 }
  0x28   : > { %471 = vmatprep.mubr.bf16.mxu0 %v1140_v0  ;;  %524 = vmatprep.mubr.bf16.mxu1 %v1140_v0 }
  0x2f   : > { %1030 = vmatmul.mubr.msk.bf16.vlgmr.msra.gmra.mrb[8].mxu0 %vm326_vm0, %v1088_v23  ;;  %1032 = vmatmul.mubr.msk.bf16.vlgmr.msra.gmra.mrb[8].mxu1 %vm326_vm0, %v1088_v23 }
  0x30   : > { %481 = vmatprep.mubr.bf16.mxu0 %v1140_v0  ;;  %534 = vmatprep.mubr.bf16.mxu1 %v1140_v0 }
  0x37   : > { %1031 = vmatmul.mubr.msk.bf16.gmra.mrb[12].mxu0 %vm326_vm0, %v1089_v34  ;;  %1033 = vmatmul.mubr.msk.bf16.gmra.mrb[12].mxu1 %vm326_vm0, %v1089_v34 }
  0xf2   : > { %v1240_v35 = vpop.f32.mrb[0].mxu0  ;;  %v1242_v36 = vpop.f32.mrb[0].mxu1 }
  0xf3   : > { %v1244_v37 = vpop.f32.mrb[1].mxu0  ;;  %v1246_v38 = vpop.f32.mrb[1].mxu1 }
  0xf4   : > { %v1248_v39 = vpop.f32.mrb[2].mxu0  ;;  %v1250_v40 = vpop.f32.mrb[2].mxu1 }
  0xf5   : > { %v1252_v41 = vpop.f32.mrb[3].mxu0  ;;  %v1254_v42 = vpop.f32.mrb[3].mxu1 }
  0xfa   : > { %v1256_v43 = vpop.f32.mrb[4].mxu0  ;;  %v1258_v44 = vpop.f32.mrb[4].mxu1 }
  0xfb   : > { %v1260_v45 = vpop.f32.mrb[5].mxu0  ;;  %v1262_v46 = vpop.f32.mrb[5].mxu1 }
  0xfc   : > { %v1264_v47 = vpop.f32.mrb[6].mxu0  ;;  %v1266_v48 = vpop.f32.mrb[6].mxu1 }
  0xfd   : > { %v1268_v49 = vpop.f32.mrb[7].mxu0  ;;  %v1270_v50 = vpop.f32.mrb[7].mxu1 }
 0x102   : > { %v1272_v51 = vpop.f32.mrb[8].mxu0  ;;  %v1274_v52 = vpop.f32.mrb[8].mxu1 }
 0x103   : > { %v1276_v53 = vpop.f32.mrb[9].mxu0  ;;  %v1278_v54 = vpop.f32.mrb[9].mxu1 }
 0x104   : > { %v1280_v55 = vpop.f32.mrb[10].mxu0  ;;  %v1282_v56 = vpop.f32.mrb[10].mxu1 }
 0x105   : > { %v1284_v57 = vpop.f32.mrb[11].mxu0  ;;  %v1286_v58 = vpop.f32.mrb[11].mxu1 }
 0x107   : > { %550 = sbr.rel (!%p545_p6) target bundleno = 270 (0x10e), region = 32 }
 0x10a   : > { %v1288_v59 = vpop.f32.mrb[12].mxu0  ;;  %v1290_v60 = vpop.f32.mrb[12].mxu1 }
 0x10b   : > { %v1292_v61 = vpop.f32.mrb[13].mxu0  ;;  %v1294_v62 = vpop.f32.mrb[13].mxu1 }
 0x10c   : > { %v1296_v63 = vpop.f32.mrb[14].mxu0  ;;  %v1298_v0 = vpop.f32.mrb[14].mxu1 }
 0x10d   : > { %v1300_v1 = vpop.f32.mrb[15].mxu0  ;;  %v1302_v2 = vpop.f32.mrb[15].mxu1 }
 0x10e PF: > { %p1035_p7 = scmp.ne.s32.totalorder %s1122_s9, 0 }
 0x10f   : > { %v585_v4 = vadd.f32 (!%p1035_p7), %v1260_v45, %v1256_v43  ;;  %v567_v5 = vadd.f32 (!%p1035_p7), %v1244_v37, %v1240_v35  ;;  %v594_v6 = vadd.f32 (!%p1035_p7), %v1268_v49, %v1264_v47  ;;  %v576_v7 = vadd.f32 (!%p1035_p7), %v1252_v41, %v1248_v39 }
 0x110   : > { %562 = sbr.rel (%p1035_p7) target bundleno = 447 (0x1bf), region = 36  ;;  %v624_v8 = vmul.f32 (!%p1035_p7), %v1248_v39, %v1248_v39  ;;  %v625_v9 = vmul.f32 (!%p1035_p7), %v1252_v41, %v1252_v41  ;;  %v626_v14 = vmul.f32 (!%p1035_p7), %v1250_v40, %v1250_v40  ;;  %v627_v15 = vmul.f32 (!%p1035_p7), %v1254_v42, %v1254_v42 }
 0x111   : > { %v586_v10 = vadd.f32 (!%p1035_p7), %v585_v4, %v1258_v44  ;;  %v568_v11 = vadd.f32 (!%p1035_p7), %v567_v5, %v1242_v36  ;;  %v595_v12 = vadd.f32 (!%p1035_p7), %v594_v6, %v1266_v48  ;;  %v577_v13 = vadd.f32 (!%p1035_p7), %v576_v7, %v1250_v40 }
 0x112   : > { %v628_v20 = vmul.f32 (!%p1035_p7), %v1280_v55, %v1280_v55  ;;  %v657_v21 = vadd.f32 (!%p1035_p7), %v625_v9, %v624_v8  ;;  %v616_v22 = vmul.f32 (!%p1035_p7), %v1240_v35, %v1240_v35  ;;  %v617_v23 = vmul.f32 (!%p1035_p7), %v1244_v37, %v1244_v37 }
 0x113   : > { %v587_v16 = vadd.f32 (!%p1035_p7), %v586_v10, %v1262_v46  ;;  %v569_v17 = vadd.f32 (!%p1035_p7), %v568_v11, %v1246_v38  ;;  %v596_v18 = vadd.f32 (!%p1035_p7), %v595_v12, %v1270_v50  ;;  %v578_v19 = vadd.f32 (!%p1035_p7), %v577_v13, %v1254_v42 }
 0x114   : > { %v629_v28 = vmul.f32 (!%p1035_p7), %v1284_v57, %v1284_v57  ;;  %v630_v29 = vmul.f32 (!%p1035_p7), %v1282_v56, %v1282_v56  ;;  %v658_v30 = vadd.f32 (!%p1035_p7), %v657_v21, %v626_v14  ;;  %v618_v31 = vmul.f32 (!%p1035_p7), %v1242_v36, %v1242_v36 }
 0x115   : > { %v588_v24 = vadd.f32 (!%p1035_p7), %v587_v16, %v1288_v59  ;;  %v570_v25 = vadd.f32 (!%p1035_p7), %v569_v17, %v1272_v51  ;;  %v597_v26 = vadd.f32 (!%p1035_p7), %v596_v18, %v1296_v63  ;;  %v579_v27 = vadd.f32 (!%p1035_p7), %v578_v19, %v1280_v55 }
 0x116   : > { %v659_v4 = vadd.f32 (!%p1035_p7), %v658_v30, %v627_v15  ;;  %v619_v5 = vmul.f32 (!%p1035_p7), %v1246_v38, %v1246_v38  ;;  %v620_v6 = vmul.f32 (!%p1035_p7), %v1272_v51, %v1272_v51  ;;  %v648_v7 = vadd.f32 (!%p1035_p7), %v617_v23, %v616_v22 }
 0x117   : > { %v589_v32 = vadd.f32 %v588_v24, %v1292_v61  ;;  %v571_v33 = vadd.f32 %v570_v25, %v1276_v53  ;;  %v598_v34 = vadd.f32 %v597_v26, %v1300_v1  ;;  %v580_v3 = vadd.f32 %v579_v27, %v1284_v57 }
 0x118   : > { %v660_v12 = vadd.f32 %v659_v4, %v628_v20  ;;  %v649_v13 = vadd.f32 %v648_v7, %v618_v31  ;;  %v640_v14 = vmul.f32 %v1264_v47, %v1264_v47  ;;  %v641_v15 = vmul.f32 %v1268_v49, %v1268_v49 }
 0x119   : > { %v590_v8 = vadd.f32 %v589_v32, %v1290_v60  ;;  %v572_v9 = vadd.f32 %v571_v33, %v1274_v52  ;;  %v599_v10 = vadd.f32 %v598_v34, %v1298_v0  ;;  %v581_v11 = vadd.f32 %v580_v3, %v1282_v56 }
 0x11a   : > { %v631_v18 = vmul.f32 %v1286_v58, %v1286_v58  ;;  %v661_v19 = vadd.f32 %v660_v12, %v629_v28  ;;  %v621_v21 = vmul.f32 %v1276_v53, %v1276_v53  ;;  %v650_v22 = vadd.f32 %v649_v13, %v619_v5 }
 0x11b   : > { %v591_v16 = vadd.f32 %v590_v8, %v1294_v62  ;;  %v573_v17 = vadd.f32 %v572_v9, %v1278_v54  ;;  %v642_v20 = vmul.f32 %v1266_v48, %v1266_v48  ;;  %v600_v23 = vadd.f32 %v599_v10, %v1302_v2 }
 0x11c   : > { %v582_v24 = vadd.f32 %v581_v11, %v1286_v58  ;;  %v622_v25 = vmul.f32 %v1274_v52, %v1274_v52  ;;  %v662_v26 = vadd.f32 %v661_v19, %v630_v29  ;;  %v651_v27 = vadd.f32 %v650_v22, %v620_v6 }
 0x11d   : > { %592 = vadd.xlane.f32.xlu1 %v591_v16  ;;  %574 = vadd.xlane.f32.xlu0 %v573_v17  ;;  %v643_v28 = vmul.f32 %v1270_v50, %v1270_v50  ;;  %v675_v30 = vadd.f32 %v641_v15, %v640_v14  ;;  %v623_v31 = vmul.f32 %v1278_v54, %v1278_v54  ;;  %vm607_vm2 = vcmask 7168  }
 0x11e   : > { %v632_v32 = vmul.f32 %v1256_v43, %v1256_v43  ;;  %v633_v33 = vmul.f32 %v1260_v45, %v1260_v45  ;;  %v652_v34 = vadd.f32 %v651_v27, %v621_v21  ;;  %v644_v3 = vmul.f32 %v1296_v63, %v1296_v63 }
 0x11f   : > { %v676_v4 = vadd.f32 %v675_v30, %v642_v20  ;;  %v634_v29 = vmul.f32 %v1258_v44, %v1258_v44  ;;  %v663_v5 = vadd.f32 %v662_v26, %v631_v18  ;;  %v645_v6 = vmul.f32 %v1300_v1, %v1300_v1  ;;  %v563_v30 = vld [vmem:[#allocation2] sm:$0xff] }
 0x120   : > { %v653_v7 = vadd.f32 %v652_v34, %v622_v25  ;;  %v635_v9 = vmul.f32 %v1262_v46, %v1262_v46  ;;  %v666_v10 = vadd.f32 %v633_v33, %v632_v32  ;;  %v646_v11 = vmul.f32 %v1298_v0, %v1298_v0 }
 0x121   : > { %601 = vadd.xlane.f32.xlu1 %v600_v23  ;;  %583 = vadd.xlane.f32.xlu0 %v582_v24  ;;  %v677_v8 = vadd.f32 %v676_v4, %v643_v28  ;;  %v636_v14 = vmul.f32 %v1288_v59, %v1288_v59  ;;  %v647_v16 = vmul.f32 %v1302_v2, %v1302_v2  ;;  %v565_v28 = vld [vmem:[#allocation2 + $0x10] sm:$0xff]  ;;  %v564_v4 = vld [vmem:[#allocation2 + $0x8] sm:$0xff] }
 0x122   : > { %v654_v12 = vadd.f32 %v653_v7, %v623_v31  ;;  %v667_v15 = vadd.f32 %v666_v10, %v634_v29  ;;  %v637_v18 = vmul.f32 %v1292_v61, %v1292_v61  ;;  %v638_v22 = vmul.f32 %v1290_v60, %v1290_v60 }
 0x123   : > { %v678_v13 = vadd.f32 %v677_v8, %v644_v3  ;;  %v639_v24 = vmul.f32 %v1294_v62, %v1294_v62  ;;  %v566_v3 = vld [vmem:[#allocation2 + $0x18] sm:$0xff]  ;;  %v613_v8 = vld [vmem:[#allocation3 + $0x8] sm:$0xff] }
 0x124   : > { %v668_v19 = vadd.f32 %v667_v15, %v635_v9  ;;  %v612_v9 = vld [vmem:[#allocation3] sm:$0xff] }
 0x125   : > { %664 = vadd.xlane.f32.xlu1 %v663_v5  ;;  %655 = vadd.xlane.f32.xlu0 %v654_v12  ;;  %v679_v17 = vadd.f32 %v678_v13, %v645_v6 }
 0x126   : > { %v669_v20 = vadd.f32 %v668_v19, %v636_v14  ;;  %v615_v14 = vld [vmem:[#allocation3 + $0x18] sm:$0xff] }
 0x127   : > { %v680_v21 = vadd.f32 %v679_v17, %v646_v11  ;;  %v614_v17 = vld [vmem:[#allocation3 + $0x10] sm:$0xff] }
 0x128   : > { %v670_v25 = vadd.f32 %v669_v20, %v637_v18 }
 0x129   : > { %v681_v23 = vadd.f32 %v680_v21, %v647_v16 }
 0x12a   : > { %v671_v26 = vadd.f32 %v670_v25, %v638_v22 }
 0x12b   : > { %682 = vadd.xlane.f32.xlu1 %v681_v23 }
 0x12c   : > { %v672_v27 = vadd.f32 %v671_v26, %v639_v24 }
 0x12e   : > { %673 = vadd.xlane.f32.xlu0 %v672_v27 }
 0x1aa   : > { %v593_v31 = vpop.xlane.xlu1 %592  ;;  %v575_v32 = vpop.xlane.xlu0 %574 }
 0x1ab   : > { %v605_v33 = vadd.f32 %v593_v31, %v565_v28  ;;  %v603_v34 = vadd.f32 %v575_v32, %v563_v30 }
 0x1ad   : > { %610 = vst.msk [vmem:[#allocation2 + $0x10] sm:$0xff] %vm607_vm2, %v605_v33  ;;  %608 = vst.msk [vmem:[#allocation2] sm:$0xff] %vm607_vm2, %v603_v34 }
 0x1ae   : > { %v602_v29 = vpop.xlane.xlu1 %601  ;;  %v584_v5 = vpop.xlane.xlu0 %583 }
 0x1af   : > { %v606_v6 = vadd.f32 %v602_v29, %v566_v3  ;;  %v604_v7 = vadd.f32 %v584_v5, %v564_v4 }
 0x1b1   : > { %611 = vst.msk [vmem:[#allocation2 + $0x18] sm:$0xff] %vm607_vm2, %v606_v6  ;;  %609 = vst.msk [vmem:[#allocation2 + $0x8] sm:$0xff] %vm607_vm2, %v604_v7 }
 0x1b2   : > { %v665_v10 = vpop.xlane.xlu1 %664  ;;  %v656_v12 = vpop.xlane.xlu0 %655 }
 0x1b3   : > { %v685_v11 = vadd.f32 %v665_v10, %v613_v8  ;;  %v684_v13 = vadd.f32 %v656_v12, %v612_v9 }
 0x1b5   : > { %689 = vst.msk [vmem:[#allocation3 + $0x8] sm:$0xff] %vm607_vm2, %v685_v11  ;;  %688 = vst.msk [vmem:[#allocation3] sm:$0xff] %vm607_vm2, %v684_v13 }
 0x1b8   : > { %v683_v15 = vpop.xlane.xlu1 %682 }
 0x1b9   : > { %v687_v16 = vadd.f32 %v683_v15, %v615_v14 }
 0x1bb   : > { %691 = vst.msk [vmem:[#allocation3 + $0x18] sm:$0xff] %vm607_vm2, %v687_v16  ;;  %v674_v18 = vpop.xlane.xlu0 %673 }
 0x1bc   : > { %v686_v19 = vadd.f32 %v674_v18, %v614_v17 }
 0x1be   : > { %690 = vst.msk [vmem:[#allocation3 + $0x10] sm:$0xff] %vm607_vm2, %v686_v19 }
 0x1bf PF: > { %p692_p8 = scmp.eq.s32.totalorder %s1122_s9, 1 }
 0x1c0   : > { %v697_v21 = vld [vmem:[#allocation2] sm:$0xff] (%p692_p8)  ;;  %vm725_vm3 = vcmask (%p692_p8), 7168   ;;  %v698_v20 = vld [vmem:[#allocation2 + $0x8] sm:$0xff] (%p692_p8)  ;;  %v699_v27 = vld [vmem:[#allocation2 + $0x10] sm:$0xff] (%p692_p8) }
 0x1c1   : > { %696 = sbr.rel (!%p692_p8) target bundleno = 475 (0x1db), region = 40  ;;  %v705_v22 = vld [vmem:[#allocation3] sm:$0xff] (%p692_p8)  ;;  %v701_v23 = vmul.f32 (%p692_p8), 0.0009765625, %v697_v21  ;;  %v702_v25 = vmul.f32 (%p692_p8), 0.0009765625, %v698_v20  ;;  %v706_v26 = vld [vmem:[#allocation3 + $0x8] sm:$0xff] (%p692_p8)  ;;  %v703_v31 = vmul.f32 (%p692_p8), 0.0009765625, %v699_v27 }
 0x1c2   : > { %v709_v24 = vmul.f32 (%p692_p8), 0.0009765625, %v705_v22  ;;  %v710_v30 = vmul.f32 (%p692_p8), 0.0009765625, %v706_v26  ;;  %v700_v33 = vld [vmem:[#allocation2 + $0x18] sm:$0xff] (%p692_p8) }
 0x1c3   : > { %v708_v34 = vld [vmem:[#allocation3 + $0x18] sm:$0xff] (%p692_p8)  ;;  %v713_v3 = vmul.f32 (%p692_p8), %v701_v23, %v701_v23  ;;  %726 = vst.msk [vmem:[#allocation4] sm:$0xff] (%p692_p8), %vm725_vm3, %v701_v23  ;;  %v714_v4 = vmul.f32 (%p692_p8), %v702_v25, %v702_v25  ;;  %727 = vst.msk [vmem:[#allocation4 + $0x8] sm:$0xff] (%p692_p8), %vm725_vm3, %v702_v25  ;;  %v704_v29 = vmul.f32 (%p692_p8), 0.0009765625, %v700_v33  ;;  %v715_v6 = vmul.f32 (%p692_p8), %v703_v31, %v703_v31 }
 0x1c4   : > { %v712_v5 = vmul.f32 (%p692_p8), 0.0009765625, %v708_v34  ;;  %728 = vst.msk [vmem:[#allocation4 + $0x10] sm:$0xff] (%p692_p8), %vm725_vm3, %v703_v31 }
 0x1c5   : > { %v707_v28 = vld [vmem:[#allocation3 + $0x10] sm:$0xff] (%p692_p8)  ;;  %v717_v7 = vsub.f32 (%p692_p8), %v709_v24, %v713_v3  ;;  %v718_v8 = vsub.f32 (%p692_p8), %v710_v30, %v714_v4  ;;  %v716_v9 = vmul.f32 (%p692_p8), %v704_v29, %v704_v29  ;;  %729 = vst.msk [vmem:[#allocation4 + $0x18] sm:$0xff] (%p692_p8), %vm725_vm3, %v704_v29 }
 0x1c6   : > { %v711_v32 = vmul.f32 (%p692_p8), 0.0009765625, %v707_v28 }
 0x1c7   : > { %v721_v11 = vmax.f32 (%p692_p8), %v717_v7, 0.0  ;;  %v722_v12 = vmax.f32 (%p692_p8), %v718_v8, 0.0  ;;  %v720_v13 = vsub.f32 (%p692_p8), %v712_v5, %v716_v9 }
 0x1c8   : > { %v719_v10 = vsub.f32 %v711_v32, %v715_v6 }
 0x1c9   : > { %v730_v15 = vadd.f32 1e-05, %v721_v11  ;;  %v731_v16 = vadd.f32 1e-05, %v722_v12  ;;  %v724_v17 = vmax.f32 %v720_v13, 0.0 }
 0x1ca   : > { %v723_v14 = vmax.f32 %v719_v10, 0.0 }
 0x1cb   : > { %1090 = vrsqrt.f32 %v730_v15  ;;  %v733_v19 = vadd.f32 1e-05, %v724_v17 }
 0x1cc   : > { %v732_v18 = vadd.f32 1e-05, %v723_v14  ;;  %1092 = vrsqrt.f32 %v731_v16 }
 0x1ce   : > { %1094 = vrsqrt.f32 %v732_v18 }
 0x1cf   : > { %1096 = vrsqrt.f32 %v733_v19 }
 0x1d5   : > { %v1091_v21 = vpop.eup %1090 }
 0x1d6   : > { %v1093_v22 = vpop.eup %1092  ;;  %738 = vst.msk [vmem:[#allocation5] sm:$0xff] %vm725_vm3, %v1091_v21 }
 0x1d7   : > { %739 = vst.msk [vmem:[#allocation5 + $0x8] sm:$0xff] %vm725_vm3, %v1093_v22 }
 0x1d8   : > { %v1095_v20 = vpop.eup %1094 }
 0x1d9   : > { %v1097_v23 = vpop.eup %1096  ;;  %740 = vst.msk [vmem:[#allocation5 + $0x10] sm:$0xff] %vm725_vm3, %v1095_v20 }
 0x1da   : > { %741 = vst.msk [vmem:[#allocation5 + $0x18] sm:$0xff] %vm725_vm3, %v1097_v23 }
 0x1db PF: > { %p1037_p9 = scmp.ne.s32.totalorder %s1122_s9, 1 }
 0x1dc   : > { %v1142_v26 = vmov (!%p1037_p9), 0  }
 0x1dd   : > { %744 = sbr.rel (%p1037_p9) target bundleno = 633 (0x279), region = 44  ;;  %v745_v25 = vld [vmem:[#allocation4] sm:$0xff] (!%p1037_p9)  ;;  %1099 = vset.pattern.permute.xlu1 (!%p1037_p9), %v1142_v26  ;;  %1098 = vset.pattern.permute.xlu0 (!%p1037_p9), %v1142_v26  ;;  %v746_v28 = vld [vmem:[#allocation4 + $0x8] sm:$0xff] (!%p1037_p9) }
 0x1de   : > { %v747_v24 = vld [vmem:[#allocation4 + $0x10] sm:$0xff] (!%p1037_p9)  ;;  %751 = vperm.xlu0 (!%p1037_p9), %1098, %v745_v25   ;;  %v802_v30 = vld [vmem:[#allocation5 + $0x8] sm:$0xff] (!%p1037_p9)  ;;  %v801_v31 = vld [vmem:[#allocation5] sm:$0xff] (!%p1037_p9) }
 0x1df   : > { %761 = vperm.xlu1 (!%p1037_p9), %1099, %v747_v24   ;;  %v748_v27 = vld [vmem:[#allocation4 + $0x18] sm:$0xff] (!%p1037_p9) }
 0x1e0   : > { %v803_v33 = vld [vmem:[#allocation5 + $0x10] sm:$0xff] (!%p1037_p9) }
 0x1e1   : > { %v804_v32 = vld [vmem:[#allocation5 + $0x18] sm:$0xff] (!%p1037_p9) }
 0x1e2   : > { %756 = vperm.xlu0 (!%p1037_p9), %1098, %v746_v28  }
 0x1e3   : > { %766 = vperm.xlu1 (!%p1037_p9), %1099, %v748_v27  }
 0x1e6   : > { %807 = vperm.xlu0 %1098, %v801_v31  }
 0x1e7   : > { %812 = vperm.xlu1 %1099, %v802_v30  }
 0x1ea   : > { %817 = vperm.xlu0 %1098, %v803_v33  }
 0x1eb   : > { %822 = vperm.xlu1 %1099, %v804_v32  }
 0x25d   : > { %v752_v3 = vpop.permute.xlu0 %751 }
 0x25e   : > { %v1421_v34 = vpop.permute.xlu1 %761  ;;  %v769_v4 = vsub.f32 %v1240_v35, %v752_v3  ;;  %v770_v29 = vsub.f32 %v1244_v37, %v752_v3  ;;  %v771_v5 = vsub.f32 %v1242_v36, %v752_v3  ;;  %v772_v6 = vsub.f32 %v1246_v38, %v752_v3 }
 0x25f   : > { %v773_v7 = vsub.f32 %v1272_v51, %v752_v3  ;;  %v774_v8 = vsub.f32 %v1276_v53, %v752_v3  ;;  %v775_v9 = vsub.f32 %v1274_v52, %v752_v3  ;;  %v776_v10 = vsub.f32 %v1278_v54, %v752_v3 }
 0x260   : > { %v785_v11 = vsub.f32 %v1256_v43, %v1421_v34  ;;  %v786_v35 = vsub.f32 %v1260_v45, %v1421_v34  ;;  %v787_v37 = vsub.f32 %v1258_v44, %v1421_v34  ;;  %v788_v36 = vsub.f32 %v1262_v46, %v1421_v34 }
 0x261   : > { %v757_v51 = vpop.permute.xlu0 %756  ;;  %v789_v52 = vsub.f32 %v1288_v59, %v1421_v34  ;;  %v790_v53 = vsub.f32 %v1292_v61, %v1421_v34  ;;  %v791_v54 = vsub.f32 %v1290_v60, %v1421_v34  ;;  %v792_v12 = vsub.f32 %v1294_v62, %v1421_v34 }
 0x262   : > { %v1439_v38 = vpop.permute.xlu1 %766  ;;  %v777_v13 = vsub.f32 %v1248_v39, %v757_v51  ;;  %v778_v14 = vsub.f32 %v1252_v41, %v757_v51  ;;  %v779_v15 = vsub.f32 %v1250_v40, %v757_v51  ;;  %v780_v16 = vsub.f32 %v1254_v42, %v757_v51 }
 0x263   : > { %v781_v17 = vsub.f32 %v1280_v55, %v757_v51  ;;  %v782_v18 = vsub.f32 %v1284_v57, %v757_v51  ;;  %v783_v19 = vsub.f32 %v1282_v56, %v757_v51  ;;  %v784_v21 = vsub.f32 %v1286_v58, %v757_v51 }
 0x264   : > { %v793_v22 = vsub.f32 %v1264_v47, %v1439_v38  ;;  %v794_v39 = vsub.f32 %v1268_v49, %v1439_v38  ;;  %v795_v41 = vsub.f32 %v1266_v48, %v1439_v38  ;;  %v796_v40 = vsub.f32 %v1270_v50, %v1439_v38 }
 0x265   : > { %v808_v55 = vpop.permute.xlu0 %807  ;;  %v797_v56 = vsub.f32 %v1296_v63, %v1439_v38  ;;  %v798_v47 = vsub.f32 %v1300_v1, %v1439_v38  ;;  %v799_v49 = vsub.f32 %v1298_v0, %v1439_v38  ;;  %v800_v48 = vsub.f32 %v1302_v2, %v1439_v38 }
 0x266   : > { %v813_v42 = vpop.permute.xlu1 %812  ;;  %v825_v0 = vmul.f32 %v808_v55, %v769_v4  ;;  %v826_v1 = vmul.f32 %v808_v55, %v770_v29  ;;  %v827_v2 = vmul.f32 %v808_v55, %v771_v5  ;;  %v828_v26 = vmul.f32 %v808_v55, %v772_v6 }
 0x267   : > { %v833_v57 = vmul.f32 %v813_v42, %v777_v13  ;;  %v834_v50 = vmul.f32 %v813_v42, %v778_v14  ;;  %v835_v58 = vmul.f32 %v813_v42, %v779_v15  ;;  %v836_v20 = vmul.f32 %v813_v42, %v780_v16 }
 0x268   : > { %v837_v23 = vmul.f32 %v813_v42, %v781_v17  ;;  %v838_v24 = vmul.f32 %v813_v42, %v782_v18  ;;  %v839_v63 = vmul.f32 %v813_v42, %v783_v19  ;;  %v840_v25 = vmul.f32 %v813_v42, %v784_v21  ;;  %857 = vst [vmem:[%s1200_s23] sm:$0xff] %v825_v0 }
 0x269   : > { %865 = vst [vmem:[%s1200_s23 + $0x40] sm:$0xff] %v833_v57  ;;  %866 = vst [vmem:[%s1200_s23 + $0x48] sm:$0xff] %v834_v50  ;;  %v829_v27 = vmul.f32 %v808_v55, %v773_v7  ;;  %v830_v28 = vmul.f32 %v808_v55, %v774_v8  ;;  %v831_v30 = vmul.f32 %v808_v55, %v775_v9  ;;  %v818_v33 = vpop.permute.xlu0 %817 }
 0x26a   : > { %867 = vst [vmem:[%s1200_s23 + $0x50] sm:$0xff] %v835_v58  ;;  %868 = vst [vmem:[%s1200_s23 + $0x58] sm:$0xff] %v836_v20  ;;  %v832_v31 = vmul.f32 %v808_v55, %v776_v10  ;;  %v823_v32 = vpop.permute.xlu1 %822  ;;  %v841_v10 = vmul.f32 %v818_v33, %v785_v11  ;;  %v842_v38 = vmul.f32 %v818_v33, %v786_v35 }
 0x26b   : > { %869 = vst [vmem:[%s1200_s23 + $0x60] sm:$0xff] %v837_v23  ;;  %870 = vst [vmem:[%s1200_s23 + $0x68] sm:$0xff] %v838_v24  ;;  %v849_v3 = vmul.f32 %v823_v32, %v793_v22  ;;  %v850_v4 = vmul.f32 %v823_v32, %v794_v39  ;;  %v851_v29 = vmul.f32 %v823_v32, %v795_v41 }
 0x26c   : > { %871 = vst [vmem:[%s1200_s23 + $0x70] sm:$0xff] %v839_v63  ;;  %872 = vst [vmem:[%s1200_s23 + $0x78] sm:$0xff] %v840_v25  ;;  %v852_v5 = vmul.f32 %v823_v32, %v796_v40  ;;  %v853_v6 = vmul.f32 %v823_v32, %v797_v56  ;;  %v854_v7 = vmul.f32 %v823_v32, %v798_v47 }
 0x26d   : > { %858 = vst [vmem:[%s1200_s23 + $0x8] sm:$0xff] %v826_v1  ;;  %859 = vst [vmem:[%s1200_s23 + $0x10] sm:$0xff] %v827_v2  ;;  %v855_v8 = vmul.f32 %v823_v32, %v799_v49  ;;  %v856_v9 = vmul.f32 %v823_v32, %v800_v48  ;;  %v843_v51 = vmul.f32 %v818_v33, %v787_v37 }
 0x26e   : > { %860 = vst [vmem:[%s1200_s23 + $0x18] sm:$0xff] %v828_v26  ;;  %861 = vst [vmem:[%s1200_s23 + $0x20] sm:$0xff] %v829_v27  ;;  %v844_v13 = vmul.f32 %v818_v33, %v788_v36  ;;  %v845_v43 = vmul.f32 %v818_v33, %v789_v52  ;;  %v846_v44 = vmul.f32 %v818_v33, %v790_v53 }
 0x26f   : > { %862 = vst [vmem:[%s1200_s23 + $0x28] sm:$0xff] %v830_v28  ;;  %863 = vst [vmem:[%s1200_s23 + $0x30] sm:$0xff] %v831_v30  ;;  %v847_v45 = vmul.f32 %v818_v33, %v791_v54  ;;  %v848_v46 = vmul.f32 %v818_v33, %v792_v12 }
 0x270   : > { %864 = vst [vmem:[%s1200_s23 + $0x38] sm:$0xff] %v832_v31  ;;  %881 = vst [vmem:[%s1200_s23 + $0xc0] sm:$0xff] %v849_v3 }
 0x271   : > { %882 = vst [vmem:[%s1200_s23 + $0xc8] sm:$0xff] %v850_v4  ;;  %883 = vst [vmem:[%s1200_s23 + $0xd0] sm:$0xff] %v851_v29 }
 0x272   : > { %884 = vst [vmem:[%s1200_s23 + $0xd8] sm:$0xff] %v852_v5  ;;  %885 = vst [vmem:[%s1200_s23 + $0xe0] sm:$0xff] %v853_v6 }
 0x273   : > { %886 = vst [vmem:[%s1200_s23 + $0xe8] sm:$0xff] %v854_v7  ;;  %887 = vst [vmem:[%s1200_s23 + $0xf0] sm:$0xff] %v855_v8 }
 0x274   : > { %888 = vst [vmem:[%s1200_s23 + $0xf8] sm:$0xff] %v856_v9  ;;  %873 = vst [vmem:[%s1200_s23 + $0x80] sm:$0xff] %v841_v10 }
 0x275   : > { %874 = vst [vmem:[%s1200_s23 + $0x88] sm:$0xff] %v842_v38  ;;  %875 = vst [vmem:[%s1200_s23 + $0x90] sm:$0xff] %v843_v51 }
 0x276   : > { %876 = vst [vmem:[%s1200_s23 + $0x98] sm:$0xff] %v844_v13  ;;  %877 = vst [vmem:[%s1200_s23 + $0xa0] sm:$0xff] %v845_v43 }
 0x277   : > { %878 = vst [vmem:[%s1200_s23 + $0xa8] sm:$0xff] %v846_v44  ;;  %879 = vst [vmem:[%s1200_s23 + $0xb0] sm:$0xff] %v847_v45 }
 0x278   : > { %880 = vst [vmem:[%s1200_s23 + $0xb8] sm:$0xff] %v848_v46 }
 0x279 PF: > { %s12_s13 = sadd.s32 1, %s1138_s13   ;;  %s1547_s9 = smov %s1130_s11 }
 0x27a   : > { %p9_p10 = scmp.ge.s32.totalorder %s12_s13, 6   ;;  %s1548_s10 = smov %s1134_s12 }
 0x27b   : > { %s1549_s11 = smov %s1552_s14  ;;  %s1550_s12 = smov %s1556_s15 }
 0x27c   :  { %11 = sbr.rel (!%p9_p10) target bundleno = 3 (0x3), region = 77 }

</bundles_post_ra>
